<compile_context>
chip_gen: v7x
topology: tpu7x:2x2x1
jax: 0.10.0
libtpu: 0.0.40
codegen_flags: <defaults>
</compile_context>

<pallas_src>
import functools
import math

import jax
import jax.numpy as jnp
from jax.experimental import pallas as pl
from jax.experimental.pallas import tpu as pltpu


def _sdpa_kernel(q_ref, k_ref, v_ref,
                 wq_ref, bq_ref, wk_ref, bk_ref,
                 wv_ref, bv_ref, wo_ref, bo_ref,
                 o_ref, *, b_tile, nq, nk, h, d_k, d_v, scale, compute_dtype):
    cd = compute_dtype

    # Activation blocks arrive already flattened to (b_tile*seq, d_model).
    q_in = q_ref[...].astype(cd)
    k_in = k_ref[...].astype(cd)
    v_in = v_ref[...].astype(cd)

    # Q/K/V projections: tall (M = b_tile*seq) matmuls, f32 accumulation.
    # Weights were pre-cast to compute_dtype in the wrapper; biases stay f32.
    qp = jnp.dot(q_in, wq_ref[...], preferred_element_type=jnp.float32) + bq_ref[...]
    kp = jnp.dot(k_in, wk_ref[...], preferred_element_type=jnp.float32) + bk_ref[...]
    vp = jnp.dot(v_in, wv_ref[...], preferred_element_type=jnp.float32) + bv_ref[...]

    # Cast ONCE to the MXU compute dtype, then relayout to head-major:
    # one transpose per tensor (XLU, otherwise idle here) instead of h
    # per-head lane slices / K=16 matmuls / a serialized accumulator chain.
    q3 = (qp.astype(cd).reshape(b_tile, nq, h, d_k)
          .transpose(0, 2, 1, 3).reshape(b_tile * h, nq, d_k))
    k3 = (kp.astype(cd).reshape(b_tile, nk, h, d_k)
          .transpose(0, 2, 1, 3).reshape(b_tile * h, nk, d_k))
    v3 = (vp.astype(cd).reshape(b_tile, nk, h, d_v)
          .transpose(0, 2, 1, 3).reshape(b_tile * h, nk, d_v))

    # Scores for every (batch, head) pair in one batched contraction; the
    # contraction is last-dim/last-dim, so no K transpose is materialized.
    att = jnp.einsum('bqd,bkd->bqk', q3, k3,
                     preferred_element_type=jnp.float32) * scale

    # Numerically-stable softmax, all in f32, EXACT normalization (matches the
    # PyTorch module; the approximate EUP reciprocal was the prior mismatch).
    att = att - jnp.max(att, axis=-1, keepdims=True)
    p = jnp.exp(att)
    p = p / jnp.sum(p, axis=-1, keepdims=True)

    # Context for all heads in one batched contraction.
    ctx = jnp.einsum('bqk,bkd->bqd', p.astype(cd), v3,
                     preferred_element_type=jnp.float32)      # (bt*h, nq, d_v)

    # Back to (bt*nq, h*d_v) and a single output-projection matmul
    # (no per-head wo slices, no accumulation chain).
    ctx = (ctx.reshape(b_tile, h, nq, d_v)
           .transpose(0, 2, 1, 3).reshape(b_tile * nq, h * d_v).astype(cd))
    out = jnp.dot(ctx, wo_ref[...], preferred_element_type=jnp.float32) + bo_ref[...]

    o_ref[...] = out.astype(o_ref.dtype)


def _pick_batch_tile(b_s, nq, target_rows=256, min_grid_steps=1):
    """Largest divisor of b_s with b_tile*nq <= target_rows.

    target_rows=256 fills the 2x256 MXU rows on v6e/v7x (128 only half-fills
    it). min_grid_steps=1 by default: v5e/v6e have ONE TensorCore, so forcing
    extra grid steps only adds ~0.35 us/step pipeline overhead.  On v7x pass
    min_grid_steps=2 so both TensorCores get a batch tile.
    """
    divisors = [d for d in range(1, b_s + 1) if b_s % d == 0]
    fitting = [d for d in divisors if d * nq <= target_rows] or [1]
    stepped = [d for d in fitting if (b_s // d) >= min_grid_steps]
    return max(stepped) if stepped else min(fitting)


def _vmem_budget_bytes(b_tile, nq, nk, d_model, h, d_k, d_v,
                       act_itemsize, weight_itemsize):
    """Explicit scoped-VMEM budget (clamped to [32 MiB, 64 MiB])."""
    rows_q, rows_k = b_tile * nq, b_tile * nk
    # Double-buffered activation + output blocks.
    io_blocks = 2 * act_itemsize * d_model * (2 * rows_q + 2 * rows_k)
    # Weight / bias blocks (assume default double-buffering).
    weight_elems = 2 * d_model * h * d_k + d_model * h * d_v + h * d_v * d_model
    bias_elems = 2 * h * d_k + h * d_v + d_model
    weights = 2 * (weight_itemsize * weight_elems + 4 * bias_elems)
    # In-kernel intermediates (projections, scores, softmax, context), f32
    # plus one compute-dtype copy each (generous).
    interm = 8 * (rows_q * h * d_k + rows_k * h * (d_k + d_v)
                  + b_tile * h * nq * nk + rows_q * h * d_v + rows_q * d_model)
    est = io_blocks + weights + interm
    return int(min(64 << 20, max(2 * est + (8 << 20), 32 << 20)))


def scaled_dot_product_attention(queries, keys, values, params, *, h, d_k, d_v,
                                 b_tile=None, compute_dtype=jnp.float32,
                                 target_rows=256, min_grid_steps=1,
                                 single_buffer_weights=False,
                                 vmem_limit_bytes=None):
    """Fused multi-head scaled-dot-product attention forward pass.

    compute_dtype: dtype fed to the MXU matmuls.  bfloat16 is recommended for
      production on ALL TPU generations (v5e/v6e/v7x MXUs are bf16-native and
      f32 operands cost extra passes + 2x operand DMA); accumulation and all
      softmax math stay in f32.  Default f32 for bit-faithful parity with the
      f32 PyTorch module.
    min_grid_steps: set to 2 on v7x so both TensorCores get a batch tile.
    single_buffer_weights: opt-in pl.Buffered(1) on the constant-index weight
      blocks (halves resident weight VMEM); off by default (see TODO above).
    """
    b_s, nq, d_model = queries.shape
    nk = keys.shape[1]
    wq, bq, wk, bk, wv, bv, wo, bo = params

    if b_tile is None:
        b_tile = _pick_batch_tile(b_s, nq, target_rows=target_rows,
                                  min_grid_steps=min_grid_steps)
    assert b_s % b_tile == 0, "b_tile must divide the batch size"
    grid = (b_s // b_tile,)

    cd = compute_dtype
    # Pre-cast weight matrices to the compute dtype OUTSIDE the kernel: halves
    # weight HBM->VMEM DMA and resident weight VMEM when bf16, and removes the
    # per-grid-step in-kernel cast traffic.  Biases stay f32.
    wq_c, wk_c, wv_c, wo_c = (w.astype(cd) for w in (wq, wk, wv, wo))
    bq_f, bk_f, bv_f, bo_f = (b.astype(jnp.float32) for b in (bq, bk, bv, bo))

    # Flatten (batch, seq) wrapper-side: blocks become tall (b_tile*seq,
    # d_model) slabs; for production d_model (a 128-multiple) the output store
    # is lane-dense, and no in-kernel I/O reshapes are needed.
    q2 = queries.reshape(b_s * nq, d_model)
    k2 = keys.reshape(b_s * nk, d_model)
    v2 = values.reshape(b_s * nk, d_model)

    if vmem_limit_bytes is None:
        vmem_limit_bytes = _vmem_budget_bytes(
            b_tile, nq, nk, d_model, h, d_k, d_v,
            act_itemsize=queries.dtype.itemsize,
            weight_itemsize=jnp.dtype(cd).itemsize)

    kernel = functools.partial(_sdpa_kernel, b_tile=b_tile, nq=nq, nk=nk,
                               h=h, d_k=d_k, d_v=d_v,
                               scale=1.0 / math.sqrt(d_k), compute_dtype=cd)

    def weight_spec(arr):
        nd = arr.ndim
        kwargs = {}
        if single_buffer_weights:
            # Constant index_map across the grid -> nothing to pipeline.
            kwargs["pipeline_mode"] = pl.Buffered(1)
        return pl.BlockSpec(arr.shape, lambda b, _nd=nd: (0,) * _nd, **kwargs)

    act_q_spec = pl.BlockSpec((b_tile * nq, d_model), lambda b: (b, 0))
    act_k_spec = pl.BlockSpec((b_tile * nk, d_model), lambda b: (b, 0))

    out = pl.pallas_call(
        kernel,
        out_shape=jax.ShapeDtypeStruct((b_s * nq, d_model), queries.dtype),
        grid_spec=pltpu.PrefetchScalarGridSpec(
            num_scalar_prefetch=0,
            grid=grid,
            in_specs=[act_q_spec, act_k_spec, act_k_spec,
                      weight_spec(wq_c), weight_spec(bq_f),
                      weight_spec(wk_c), weight_spec(bk_f),
                      weight_spec(wv_c), weight_spec(bv_f),
                      weight_spec(wo_c), weight_spec(bo_f)],
            out_specs=pl.BlockSpec((b_tile * nq, d_model), lambda b: (b, 0)),
        ),
        # "parallel" lets the runtime shard the batch axis across TensorCores
        # on v7x (consider pltpu.CORE_PARALLEL if explicit per-core control is
        # needed); it is a no-op on single-core v5e/v6e.
        compiler_params=pltpu.CompilerParams(
            dimension_semantics=("parallel",),
            vmem_limit_bytes=vmem_limit_bytes),
    )(q2, k2, v2, wq_c, bq_f, wk_c, bk_f, wv_c, bv_f, wo_c, bo_f)

    return out.reshape(b_s, nq, d_model)


def init_params(key, d_model, d_k, d_v, h):
    """Xavier-normal weights (gain=1.0), zero biases — matches init_weights()."""
    def xavier(key, fan_in, fan_out):
        std = math.sqrt(2.0 / (fan_in + fan_out))
        # stored as (in, out) so the kernel uses x @ W
        return std * jax.random.normal(key, (fan_in, fan_out), dtype=jnp.float32)

    k1, k2, k3, k4 = jax.random.split(key, 4)
    wq = xavier(k1, d_model, h * d_k)
    wk = xavier(k2, d_model, h * d_k)
    wv = xavier(k3, d_model, h * d_v)
    wo = xavier(k4, h * d_v, d_model)
    bq = jnp.zeros((1, h * d_k), jnp.float32)
    bk = jnp.zeros((1, h * d_k), jnp.float32)
    bv = jnp.zeros((1, h * d_v), jnp.float32)
    bo = jnp.zeros((1, d_model), jnp.float32)
    return (wq, bq, wk, bk, wv, bv, wo, bo)


def reference(queries, keys, values, params, *, h, d_k, d_v):
    """Plain-JAX reference mirroring the PyTorch forward."""
    wq, bq, wk, bk, wv, bv, wo, bo = params
    b_s, nq, d_model = queries.shape
    nk = keys.shape[1]
    q = (queries @ wq + bq).reshape(b_s, nq, h, d_k).transpose(0, 2, 1, 3)
    k = (keys @ wk + bk).reshape(b_s, nk, h, d_k).transpose(0, 2, 3, 1)
    v = (values @ wv + bv).reshape(b_s, nk, h, d_v).transpose(0, 2, 1, 3)
    att = (q @ k) / math.sqrt(d_k)
    att = jax.nn.softmax(att, axis=-1)
    out = (att @ v).transpose(0, 2, 1, 3).reshape(b_s, nq, h * d_v)
    return out @ wo + bo


if __name__ == "__main__":
    d_model, d_k, d_v, h = 32, 16, 16, 4
    b_s, nq, nk = 4, 8, 8

    key = jax.random.PRNGKey(0)
    kq, kk, kv, kp = jax.random.split(key, 4)
    queries = jax.random.normal(kq, (b_s, nq, d_model), dtype=jnp.float32)
    keys = jax.random.normal(kk, (b_s, nk, d_model), dtype=jnp.float32)
    values = jax.random.normal(kv, (b_s, nk, d_model), dtype=jnp.float32)
    params = init_params(kp, d_model, d_k, d_v, h)

    ref = reference(queries, keys, values, params, h=h, d_k=d_k, d_v=d_v)

    # f32 path (default): exact softmax normalization -> matches the PyTorch
    # module numerics to MXU-f32 accuracy.
    out = scaled_dot_product_attention(queries, keys, values, params,
                                       h=h, d_k=d_k, d_v=d_v)
    out = jax.block_until_ready(out)
    assert out.shape == (b_s, nq, d_model)
    assert jnp.allclose(out, ref, atol=2e-3, rtol=2e-3), "f32 mismatch vs reference"

    # Multi-step grid path (exercises the batch-tiled pipeline / v7x-style
    # two-grid-step configuration).
    out_tiled = scaled_dot_product_attention(queries, keys, values, params,
                                             h=h, d_k=d_k, d_v=d_v,
                                             min_grid_steps=2)
    out_tiled = jax.block_until_ready(out_tiled)
    assert jnp.allclose(out_tiled, ref, atol=2e-3, rtol=2e-3), \
        "tiled-grid mismatch vs reference"

    # bf16 MXU-operand path (recommended for production on all generations):
    # operands bf16, f32 accumulation, softmax math in f32.  Loose tolerance
    # reflects bf16 operand rounding only.
    out_bf16 = scaled_dot_product_attention(queries, keys, values, params,
                                            h=h, d_k=d_k, d_v=d_v,
                                            compute_dtype=jnp.bfloat16)
    out_bf16 = jax.block_until_ready(out_bf16)
    assert jnp.allclose(out_bf16, ref, atol=1e-1, rtol=1e-1), \
        "bf16 mismatch vs reference"

    print("KERNEL_OK")
</pallas_src>

<mosaic_0001>
module attributes {stable_mosaic.version = 11 : i64} {
  func.func @_sdpa_kernel(%arg0: i32, %arg1: memref<32x32xf32, #tpu.memory_space<vmem>>, %arg2: memref<32x32xf32, #tpu.memory_space<vmem>>, %arg3: memref<32x32xf32, #tpu.memory_space<vmem>>, %arg4: memref<32x64xf32, #tpu.memory_space<vmem>>, %arg5: memref<1x64xf32, #tpu.memory_space<vmem>>, %arg6: memref<32x64xf32, #tpu.memory_space<vmem>>, %arg7: memref<1x64xf32, #tpu.memory_space<vmem>>, %arg8: memref<32x64xf32, #tpu.memory_space<vmem>>, %arg9: memref<1x64xf32, #tpu.memory_space<vmem>>, %arg10: memref<64x32xf32, #tpu.memory_space<vmem>>, %arg11: memref<1x32xf32, #tpu.memory_space<vmem>>, %arg12: memref<32x32xf32, #tpu.memory_space<vmem>>) attributes {dimension_semantics = [#tpu.dimension_semantics<parallel>], iteration_bounds = array<i64: 1>, scalar_prefetch = 0 : i64, scratch_operands = 0 : i64, tpu.core_type = #tpu.core_type<tc>, window_params = [{transform_indices = @transform_0, window_bounds = array<i64: 32, 32>}, {transform_indices = @transform_1, window_bounds = array<i64: 32, 32>}, {transform_indices = @transform_2, window_bounds = array<i64: 32, 32>}, {pipeline_mode = #tpu.pipeline_mode<synchronous>, transform_indices = @transform_3, window_bounds = array<i64: 32, 64>}, {pipeline_mode = #tpu.pipeline_mode<synchronous>, transform_indices = @transform_4, window_bounds = array<i64: 1, 64>}, {pipeline_mode = #tpu.pipeline_mode<synchronous>, transform_indices = @transform_5, window_bounds = array<i64: 32, 64>}, {pipeline_mode = #tpu.pipeline_mode<synchronous>, transform_indices = @transform_6, window_bounds = array<i64: 1, 64>}, {pipeline_mode = #tpu.pipeline_mode<synchronous>, transform_indices = @transform_7, window_bounds = array<i64: 32, 64>}, {pipeline_mode = #tpu.pipeline_mode<synchronous>, transform_indices = @transform_8, window_bounds = array<i64: 1, 64>}, {pipeline_mode = #tpu.pipeline_mode<synchronous>, transform_indices = @transform_9, window_bounds = array<i64: 64, 32>}, {pipeline_mode = #tpu.pipeline_mode<synchronous>, transform_indices = @transform_10, window_bounds = array<i64: 1, 32>}, {transform_indices = @transform_11, window_bounds = array<i64: 32, 32>}]} {
    %c0 = arith.constant 0 : index
    %c0_0 = arith.constant 0 : index
    %0 = vector.load %arg1[%c0, %c0_0] : memref<32x32xf32, #tpu.memory_space<vmem>>, vector<32x32xf32>
    %c0_1 = arith.constant 0 : index
    %c0_2 = arith.constant 0 : index
    %1 = vector.load %arg2[%c0_1, %c0_2] : memref<32x32xf32, #tpu.memory_space<vmem>>, vector<32x32xf32>
    %c0_3 = arith.constant 0 : index
    %c0_4 = arith.constant 0 : index
    %2 = vector.load %arg3[%c0_3, %c0_4] : memref<32x32xf32, #tpu.memory_space<vmem>>, vector<32x32xf32>
    %c0_5 = arith.constant 0 : index
    %c0_6 = arith.constant 0 : index
    %3 = vector.load %arg4[%c0_5, %c0_6] : memref<32x64xf32, #tpu.memory_space<vmem>>, vector<32x64xf32>
    %cst = arith.constant dense<0.000000e+00> : vector<32x64xf32>
    %4 = tpu.matmul %0, %3, %cst {dimension_numbers = #tpu.dot_dimension_numbers<[1], [0], [0], [1], [0, 0, 1, 1], [], []>} : vector<32x32xf32>, vector<32x64xf32>, vector<32x64xf32> -> vector<32x64xf32>
    %c0_7 = arith.constant 0 : index
    %c0_8 = arith.constant 0 : index
    %5 = vector.load %arg5[%c0_7, %c0_8] : memref<1x64xf32, #tpu.memory_space<vmem>>, vector<1x64xf32>
    %6 = vector.broadcast %5 : vector<1x64xf32> to vector<32x64xf32>
    %7 = arith.addf %4, %6 : vector<32x64xf32>
    %c0_9 = arith.constant 0 : index
    %c0_10 = arith.constant 0 : index
    %8 = vector.load %arg6[%c0_9, %c0_10] : memref<32x64xf32, #tpu.memory_space<vmem>>, vector<32x64xf32>
    %cst_11 = arith.constant dense<0.000000e+00> : vector<32x64xf32>
    %9 = tpu.matmul %1, %8, %cst_11 {dimension_numbers = #tpu.dot_dimension_numbers<[1], [0], [0], [1], [0, 0, 1, 1], [], []>} : vector<32x32xf32>, vector<32x64xf32>, vector<32x64xf32> -> vector<32x64xf32>
    %c0_12 = arith.constant 0 : index
    %c0_13 = arith.constant 0 : index
    %10 = vector.load %arg7[%c0_12, %c0_13] : memref<1x64xf32, #tpu.memory_space<vmem>>, vector<1x64xf32>
    %11 = vector.broadcast %10 : vector<1x64xf32> to vector<32x64xf32>
    %12 = arith.addf %9, %11 : vector<32x64xf32>
    %c0_14 = arith.constant 0 : index
    %c0_15 = arith.constant 0 : index
    %13 = vector.load %arg8[%c0_14, %c0_15] : memref<32x64xf32, #tpu.memory_space<vmem>>, vector<32x64xf32>
    %cst_16 = arith.constant dense<0.000000e+00> : vector<32x64xf32>
    %14 = tpu.matmul %2, %13, %cst_16 {dimension_numbers = #tpu.dot_dimension_numbers<[1], [0], [0], [1], [0, 0, 1, 1], [], []>} : vector<32x32xf32>, vector<32x64xf32>, vector<32x64xf32> -> vector<32x64xf32>
    %c0_17 = arith.constant 0 : index
    %c0_18 = arith.constant 0 : index
    %15 = vector.load %arg9[%c0_17, %c0_18] : memref<1x64xf32, #tpu.memory_space<vmem>>, vector<1x64xf32>
    %16 = vector.broadcast %15 : vector<1x64xf32> to vector<32x64xf32>
    %17 = arith.addf %14, %16 : vector<32x64xf32>
    %18 = vector.shape_cast %7 : vector<32x64xf32> to vector<4x8x4x16xf32>
    %19 = tpu.transpose %18, [0, 2, 1, 3] : vector<4x8x4x16xf32> -> vector<4x4x8x16xf32>
    %20 = vector.shape_cast %19 : vector<4x4x8x16xf32> to vector<16x8x16xf32>
    %21 = vector.shape_cast %12 : vector<32x64xf32> to vector<4x8x4x16xf32>
    %22 = tpu.transpose %21, [0, 2, 1, 3] : vector<4x8x4x16xf32> -> vector<4x4x8x16xf32>
    %23 = vector.shape_cast %22 : vector<4x4x8x16xf32> to vector<16x8x16xf32>
    %24 = vector.shape_cast %17 : vector<32x64xf32> to vector<4x8x4x16xf32>
    %25 = tpu.transpose %24, [0, 2, 1, 3] : vector<4x8x4x16xf32> -> vector<4x4x8x16xf32>
    %26 = vector.shape_cast %25 : vector<4x4x8x16xf32> to vector<16x8x16xf32>
    "tpu.trace_start"() <{level = 10 : i32, message = "bqd,bkd->bqk"}> : () -> ()
    %cst_19 = arith.constant dense<0.000000e+00> : vector<16x8x8xf32>
    %27 = tpu.matmul %20, %23, %cst_19 {dimension_numbers = #tpu.dot_dimension_numbers<[2], [2], [1], [1], [0, 0, 0, 1, 1, 1], [0], [0]>} : vector<16x8x16xf32>, vector<16x8x16xf32>, vector<16x8x8xf32> -> vector<16x8x8xf32>
    "tpu.trace_stop"() : () -> ()
    %cst_20 = arith.constant 2.500000e-01 : f32
    %28 = vector.broadcast %cst_20 : f32 to vector<16x8x8xf32>
    %29 = arith.mulf %27, %28 : vector<16x8x8xf32>
    %cst_21 = arith.constant dense<0xFF800000> : vector<16x8xf32>
    %30 = vector.multi_reduction <maximumf>, %29, %cst_21 [2] : vector<16x8x8xf32> to vector<16x8xf32>
    %31 = vector.shape_cast %30 : vector<16x8xf32> to vector<16x8x1xf32>
    %32 = vector.broadcast %31 : vector<16x8x1xf32> to vector<16x8x8xf32>
    %33 = arith.subf %29, %32 : vector<16x8x8xf32>
    %34 = math.exp %33 : vector<16x8x8xf32>
    %cst_22 = arith.constant dense<0.000000e+00> : vector<16x8xf32>
    %35 = vector.multi_reduction <add>, %34, %cst_22 [2] : vector<16x8x8xf32> to vector<16x8xf32>
    %36 = vector.shape_cast %35 : vector<16x8xf32> to vector<16x8x1xf32>
    %37 = vector.broadcast %36 : vector<16x8x1xf32> to vector<16x8x8xf32>
    %38 = arith.divf %34, %37 : vector<16x8x8xf32>
    "tpu.trace_start"() <{level = 10 : i32, message = "bqk,bkd->bqd"}> : () -> ()
    %cst_23 = arith.constant dense<0.000000e+00> : vector<16x8x16xf32>
    %39 = tpu.matmul %38, %26, %cst_23 {dimension_numbers = #tpu.dot_dimension_numbers<[2], [1], [1], [2], [0, 0, 0, 1, 1, 2], [0], [0]>} : vector<16x8x8xf32>, vector<16x8x16xf32>, vector<16x8x16xf32> -> vector<16x8x16xf32>
    "tpu.trace_stop"() : () -> ()
    %40 = vector.shape_cast %39 : vector<16x8x16xf32> to vector<4x4x8x16xf32>
    %41 = tpu.transpose %40, [0, 2, 1, 3] : vector<4x4x8x16xf32> -> vector<4x8x4x16xf32>
    %42 = vector.shape_cast %41 : vector<4x8x4x16xf32> to vector<32x64xf32>
    %c0_24 = arith.constant 0 : index
    %c0_25 = arith.constant 0 : index
    %43 = vector.load %arg10[%c0_24, %c0_25] : memref<64x32xf32, #tpu.memory_space<vmem>>, vector<64x32xf32>
    %cst_26 = arith.constant dense<0.000000e+00> : vector<32x32xf32>
    %44 = tpu.matmul %42, %43, %cst_26 {dimension_numbers = #tpu.dot_dimension_numbers<[1], [0], [0], [1], [0, 0, 1, 1], [], []>} : vector<32x64xf32>, vector<64x32xf32>, vector<32x32xf32> -> vector<32x32xf32>
    %c0_27 = arith.constant 0 : index
    %c0_28 = arith.constant 0 : index
    %45 = vector.load %arg11[%c0_27, %c0_28] : memref<1x32xf32, #tpu.memory_space<vmem>>, vector<1x32xf32>
    %46 = vector.broadcast %45 : vector<1x32xf32> to vector<32x32xf32>
    %47 = arith.addf %44, %46 : vector<32x32xf32>
    %c0_29 = arith.constant 0 : index
    %c0_30 = arith.constant 0 : index
    %48 = vector.load %arg12[%c0_29, %c0_30] : memref<32x32xf32, #tpu.memory_space<vmem>>, vector<32x32xf32>
    tpu.vector_store %arg12[%c0_29, %c0_30], %47 {strides = array<i32>} : memref<32x32xf32, #tpu.memory_space<vmem>>, vector<32x32xf32>,
    return
  }
  func.func @transform_0(%arg0: i32) -> (i32, i32) {
    %c0_i32 = arith.constant 0 : i32
    %c0_i32_0 = arith.constant 0 : i32
    return %arg0, %c0_i32 : i32, i32
  }
  func.func @transform_1(%arg0: i32) -> (i32, i32) {
    %c0_i32 = arith.constant 0 : i32
    %c0_i32_0 = arith.constant 0 : i32
    return %arg0, %c0_i32 : i32, i32
  }
  func.func @transform_2(%arg0: i32) -> (i32, i32) {
    %c0_i32 = arith.constant 0 : i32
    %c0_i32_0 = arith.constant 0 : i32
    return %arg0, %c0_i32 : i32, i32
  }
  func.func @transform_3(%arg0: i32) -> (i32, i32) {
    %c0_i32 = arith.constant 0 : i32
    %c0_i32_0 = arith.constant 0 : i32
    %c0_i32_1 = arith.constant 0 : i32
    return %c0_i32, %c0_i32_0 : i32, i32
  }
  func.func @transform_4(%arg0: i32) -> (i32, i32) {
    %c0_i32 = arith.constant 0 : i32
    %c0_i32_0 = arith.constant 0 : i32
    %c0_i32_1 = arith.constant 0 : i32
    return %c0_i32, %c0_i32_0 : i32, i32
  }
  func.func @transform_5(%arg0: i32) -> (i32, i32) {
    %c0_i32 = arith.constant 0 : i32
    %c0_i32_0 = arith.constant 0 : i32
    %c0_i32_1 = arith.constant 0 : i32
    return %c0_i32, %c0_i32_0 : i32, i32
  }
  func.func @transform_6(%arg0: i32) -> (i32, i32) {
    %c0_i32 = arith.constant 0 : i32
    %c0_i32_0 = arith.constant 0 : i32
    %c0_i32_1 = arith.constant 0 : i32
    return %c0_i32, %c0_i32_0 : i32, i32
  }
  func.func @transform_7(%arg0: i32) -> (i32, i32) {
    %c0_i32 = arith.constant 0 : i32
    %c0_i32_0 = arith.constant 0 : i32
    %c0_i32_1 = arith.constant 0 : i32
    return %c0_i32, %c0_i32_0 : i32, i32
  }
  func.func @transform_8(%arg0: i32) -> (i32, i32) {
    %c0_i32 = arith.constant 0 : i32
    %c0_i32_0 = arith.constant 0 : i32
    %c0_i32_1 = arith.constant 0 : i32
    return %c0_i32, %c0_i32_0 : i32, i32
  }
  func.func @transform_9(%arg0: i32) -> (i32, i32) {
    %c0_i32 = arith.constant 0 : i32
    %c0_i32_0 = arith.constant 0 : i32
    %c0_i32_1 = arith.constant 0 : i32
    return %c0_i32, %c0_i32_0 : i32, i32
  }
  func.func @transform_10(%arg0: i32) -> (i32, i32) {
    %c0_i32 = arith.constant 0 : i32
    %c0_i32_0 = arith.constant 0 : i32
    %c0_i32_1 = arith.constant 0 : i32
    return %c0_i32, %c0_i32_0 : i32, i32
  }
  func.func @transform_11(%arg0: i32) -> (i32, i32) {
    %c0_i32 = arith.constant 0 : i32
    %c0_i32_0 = arith.constant 0 : i32
    return %arg0, %c0_i32 : i32, i32
  }
}

</mosaic_0001>

<bundles_post_ra>
// kernel: tpu_custom_call.1
= control target key start
LH: loop header
LB: loop body
LE: loop exit
PB: predicated region body
PF: predicated region fallthrough
CT: control target
= control target key end

     0   :  { %16 = vsyncpa [#allocation3], 0  ;;  %s7379_s0 = inlined_call_operand.vmem [shape: f32[32,32], index: 0, kind: input, shape index: {}]   ;;  %s7380_s1 = inlined_call_operand.vmem [shape: f32[32,32], index: 1, kind: input, shape index: {}]   ;;  %s7381_s2 = inlined_call_operand.vmem [shape: f32[32,32], index: 2, kind: input, shape index: {}]   ;;  %s7382_s3 = inlined_call_operand.hbm [shape: f32[32,64], index: 3, kind: input, shape index: {}]   ;;  %s7383_s4 = inlined_call_operand.vmem [shape: f32[1,64], index: 4, kind: input, shape index: {}]   ;;  %s7384_s5 = inlined_call_operand.hbm [shape: f32[32,64], index: 5, kind: input, shape index: {}]   ;;  %s7385_s6 = inlined_call_operand.vmem [shape: f32[1,64], index: 6, kind: input, shape index: {}]   ;;  %s7386_s7 = inlined_call_operand.hbm [shape: f32[32,64], index: 7, kind: input, shape index: {}]   ;;  %s7387_s8 = inlined_call_operand.hbm [shape: f32[1,64], index: 8, kind: input, shape index: {}]   ;;  %s7388_s9 = inlined_call_operand.vmem [shape: f32[64,32], index: 9, kind: input, shape index: {}]   ;;  %s7389_s10 = inlined_call_operand.vmem [shape: f32[1,32], index: 10, kind: input, shape index: {}]   ;;  %s7390_s11 = inlined_call_operand.hbm [shape: f32[32,32], index: 11, kind: output, shape index: {}]  }
   0x1   :  { %17 = vsyncpa [#allocation6], 0 }
   0x2   :  { %18 = vsyncpa [#allocation9], 0 }
   0x3   :  { %19 = vsyncpa [#allocation4], 0  ;;  %s6164_s17 = smov [#allocation5]   ;;  %s6165_s19 = smov [#allocation2]  }
   0x4   :  { %s45_s18 = sshll.u32 %s6164_s17, 4  ;;  %s31_s20 = sshll.u32 %s6165_s19, 4  ;;  %s46_s18 = int_to_ptr.vmem [resolvable:$true] %s45_s18  ;;  %s6241_s20 = int_to_ptr.vmem [resolvable:$true] %s31_s20 }
   0x5   :  { %s6046_s23 = scalar_lea.hbm %s7384_s5, 512 }
   0x6   :  { %p6047_p0 = scmp.ne.s32.totalorder %s7384_s5, %s6046_s23  ;;  %p6050_p1 = scmp.lt.u32.totalorder %s6046_s23, %s7384_s5 }
   0x8   :  { %p6052_p2 = pnand %p6050_p1, %p6047_p0 }
   0xa   :  { %6055 = shalt.err (!%p6052_p2)
}
   0xb   :  { %s6056_s28 = scalar_lea.vmem %s46_s18, 512  ;;  %p6061_p4 = scmp.lt.s32.totalorder %s46_s18, %s46_s18 }
   0xc   :  { %p6057_p3 = scmp.ne.s32.totalorder %s46_s18, %s6056_s28  ;;  %p6062_p5 = scmp.lt.s32.totalorder %s6056_s28, %s6056_s28 }
   0xe   :  { %p6063_p6 = por %p6062_p5, %p6061_p4 }
  0x10   :  { %p6064_p7 = pnand %p6063_p6, %p6057_p3 }
  0x12   :  { %6067 = shalt.err (!%p6064_p7)
}
  0x13   :  { %s6166_s29 = smov 128   ;;  %s6167_s30 = smov 8  }
  0x14   :  { %51 = dma.hbm_to_vmem [thread:$0]  %s7384_s5, 512, %s46_s18, [#allocation6], %s6166_s29, %s6166_s29, %s6167_s30  }
  0x15   :  { %s6068_s16 = scalar_lea.hbm %s7382_s3, 512 }
  0x16   :  { %p6069_p8 = scmp.ne.s32.totalorder %s7382_s3, %s6068_s16  ;;  %p6072_p9 = scmp.lt.u32.totalorder %s6068_s16, %s7382_s3 }
  0x18   :  { %p6074_p10 = pnand %p6072_p9, %p6069_p8 }
  0x1a   :  { %6077 = shalt.err (!%p6074_p10)
}
  0x1b   :  { %s6078_s23 = scalar_lea.vmem %s6241_s20, 512  ;;  %p6083_p12 = scmp.lt.s32.totalorder %s6241_s20, %s6241_s20 }
  0x1c   :  { %p6079_p11 = scmp.ne.s32.totalorder %s6241_s20, %s6078_s23  ;;  %p6084_p13 = scmp.lt.s32.totalorder %s6078_s23, %s6078_s23 }
  0x1e   :  { %p6085_p0 = por %p6084_p13, %p6083_p12 }
  0x20   :  { %p6086_p1 = pnand %p6085_p0, %p6079_p11 }
  0x22   :  { %6089 = shalt.err (!%p6086_p1)
}
  0x23   :  { %37 = dma.hbm_to_vmem [thread:$0]  %s7382_s3, 512, %s6241_s20, [#allocation3], %s6166_s29, %s6166_s29, %s6167_s30  }
  0x24   :  { %s6168_s24 = smov [#allocation7]   ;;  %s6169_s26 = smov [#allocation8]  }
  0x25   :  { %s59_s25 = sshll.u32 %s6168_s24, 4  ;;  %s72_s27 = sshll.u32 %s6169_s26, 4  ;;  %s60_s25 = int_to_ptr.vmem [resolvable:$true] %s59_s25  ;;  %s73_s27 = int_to_ptr.vmem [resolvable:$true] %s72_s27 }
  0x26   :  { %s6090_s13 = scalar_lea.hbm %s7386_s7, 512 }
  0x27   :  { %p6091_p2 = scmp.ne.s32.totalorder %s7386_s7, %s6090_s13  ;;  %p6094_p3 = scmp.lt.u32.totalorder %s6090_s13, %s7386_s7 }
  0x29   :  { %p6096_p4 = pnand %p6094_p3, %p6091_p2 }
  0x2b   :  { %6099 = shalt.err (!%p6096_p4)
}
  0x2c   :  { %s6100_s3 = scalar_lea.vmem %s60_s25, 512  ;;  %p6105_p6 = scmp.lt.s32.totalorder %s60_s25, %s60_s25 }
  0x2d   :  { %p6101_p5 = scmp.ne.s32.totalorder %s60_s25, %s6100_s3  ;;  %p6106_p7 = scmp.lt.s32.totalorder %s6100_s3, %s6100_s3 }
  0x2f   :  { %p6107_p8 = por %p6106_p7, %p6105_p6 }
  0x31   :  { %p6108_p9 = pnand %p6107_p8, %p6101_p5 }
  0x33   :  { %6111 = shalt.err (!%p6108_p9)
}
  0x34   :  { %65 = dma.hbm_to_vmem [thread:$0]  %s7386_s7, 512, %s60_s25, [#allocation6], %s6166_s29, %s6166_s29, %s6167_s30  }
  0x35   :  { %s6112_s23 = scalar_lea.hbm %s7387_s8, 16 }
  0x36   :  { %p6113_p10 = scmp.ne.s32.totalorder %s7387_s8, %s6112_s23  ;;  %p6116_p11 = scmp.lt.u32.totalorder %s6112_s23, %s7387_s8 }
  0x38   :  { %p6118_p12 = pnand %p6116_p11, %p6113_p10 }
  0x3a   :  { %6121 = shalt.err (!%p6118_p12)
}
  0x3b   :  { %s6122_s28 = scalar_lea.vmem %s73_s27, 16  ;;  %s6126_s12 = scalar_lea.vmem %s73_s27, 32 }
  0x3c   :  { %p6123_p13 = scmp.ne.s32.totalorder %s73_s27, %s6122_s28  ;;  %p6127_p0 = scmp.lt.s32.totalorder %s73_s27, %s73_s27 }
  0x3d   :  { %p6128_p1 = scmp.lt.s32.totalorder %s6126_s12, %s6122_s28 }
  0x3f   :  { %p6129_p2 = por %p6128_p1, %p6127_p0 }
  0x41   :  { %p6130_p3 = pnand %p6129_p2, %p6123_p13 }
  0x43   :  { %6133 = shalt.err (!%p6130_p3)
}
  0x44   :  { %75 = dma.hbm_to_vmem [thread:$0]  %s7387_s8, 16, %s73_s27, [#allocation9]  }
  0x45   :  { %6156 = dma.done.wait [#allocation3], 512  }
  0x46   :  { %6157 = vsyncadd [#allocation3], 4294966784 }
  0x47   :  { %6158 = dma.done.wait [#allocation6], 1024  }
  0x48   :  { %6159 = vsyncadd [#allocation6], 4294966272 }
  0x49   :  { %6160 = dma.done.wait [#allocation9], 16  }
  0x4a   :  { %6161 = vsyncadd [#allocation9], 4294967280  ;;  %vm115_vm0 = vcmask 261120   ;;  %v104_v0 = vld [vmem:[#allocation2] sm:$0xff]  ;;  %v105_v1 = vld [vmem:[#allocation2 + $0x8] sm:$0xff]  ;;  %s6171_s15 = smov 112   ;;  %v474_v56 = vlaneseq }
  0x4b   :  { %v106_v2 = vld [vmem:[#allocation2 + $0x10] sm:$0xff]  ;;  %v5924_v3 = vpack.c.bf16 %v105_v1, %v104_v0  ;;  %v107_v4 = vld [vmem:[#allocation2 + $0x18] sm:$0xff]  ;;  %v92_v5 = vld [vmem:[%s7379_s0] sm:$0xff]  ;;  %v6173_v45 = vmov 0.0   ;;  %vm6174_vm1 = vmmov 0   ;;  %vm2181_vm2 = vcmask 130048  }
  0x4c   :  { %v5928_v6 = vpack.c.bf16 %v107_v4, %v106_v2  ;;  %5708 = vmatprep.mubr.msk.f32.mxu1 %vm115_vm0, %v92_v5  ;;  %v213_v7 = vld [vmem:[#allocation5] sm:$0xff]  ;;  %v214_v8 = vld [vmem:[#allocation5 + $0x8] sm:$0xff]  ;;  %v215_v9 = vld [vmem:[#allocation5 + $0x10] sm:$0xff]  ;;  %v6175_v54 = vmov 1983009808   ;;  %v475_v60 = vshrl.u32 %v474_v56, 7 }
  0x4d   :  { %5925 = vmatprep.subr.bf16.mxu1 %v5924_v3  ;;  %v5932_v10 = vpack.c.bf16 %v214_v8, %v213_v7  ;;  %v216_v11 = vld [vmem:[#allocation5 + $0x18] sm:$0xff]  ;;  %v321_v12 = vld [vmem:[#allocation7] sm:$0xff]  ;;  %v322_v13 = vld [vmem:[#allocation7 + $0x8] sm:$0xff]  ;;  %v472_v55 = vunpack.c.l.s4 %v6175_v54  ;;  %v6176_v57 = vmov 1934713408   ;;  %vm3414_vm3 = vcmask 64512  }
  0x4e   :  { %5927 = vmatpush3.bf16.msra.mxu1 %v5924_v3  ;;  %v5940_v14 = vpack.c.bf16 %v322_v13, %v321_v12  ;;  %v323_v15 = vld [vmem:[#allocation7 + $0x10] sm:$0xff]  ;;  %v324_v16 = vld [vmem:[#allocation7 + $0x18] sm:$0xff]  ;;  %v100_v17 = vld [vmem:[%s7381_s2] sm:$0xff]  ;;  %v5936_v21 = vpack.c.bf16 %v216_v11, %v215_v9  ;;  %v504_v58 = vunpack.c.l.s4 %v6176_v57  ;;  %s6177_s5 = smov 16   ;;  %s6178_s18 = smov 32   ;;  %vm5359_vm4 = vcmask 392192  }
  0x4f   :  { %5929 = vmatprep.subr.bf16.mxu1 %v5928_v6  ;;  %v5944_v18 = vpack.c.bf16 %v324_v16, %v323_v15  ;;  %5736 = vmatprep.mubr.msk.f32.mxu0 %vm115_vm0, %v100_v17  ;;  %v93_v19 = vld [vmem:[%s7379_s0 + $0x8] sm:$0xff]  ;;  %v94_v20 = vld [vmem:[%s7379_s0 + $0x10] sm:$0xff]  ;;  %v95_v22 = vld [vmem:[%s7379_s0 + $0x18] sm:$0xff]  ;;  %v473_v59 = vunpack.c.0.s8 %v472_v55  ;;  %s6179_s12 = smov 48   ;;  %vm5379_vm5 = vcmask 523264   ;;  %s6180_s27 = smov [#allocation10]  }
  0x50   :  { %5941 = vmatprep.subr.bf16.mxu0 %v5940_v14  ;;  %v96_v23 = vld [vmem:[%s7380_s1] sm:$0xff]  ;;  %v101_v24 = vld [vmem:[%s7381_s2 + $0x8] sm:$0xff]  ;;  %v98_v26 = vld [vmem:[%s7380_s1 + $0x10] sm:$0xff]  ;;  %v505_v63 = vunpack.c.0.s8 %v504_v58 }
  0x51   :  { %5943 = vmatpush3.bf16.msra.mxu0 %v5940_v14  ;;  %v97_v25 = vld [vmem:[%s7380_s1 + $0x8] sm:$0xff]  ;;  %v99_v27 = vld [vmem:[%s7380_s1 + $0x18] sm:$0xff]  ;;  %v102_v28 = vld [vmem:[%s7381_s2 + $0x10] sm:$0xff]  ;;  %s6170_s1 = smov 96   ;;  %v6449_v0 = vsub.s32 %v473_v59, %v475_v60 }
  0x52   :  { %5931 = vmatpush3.bf16.msra.mxu1 %v5928_v6  ;;  %5945 = vmatprep.subr.bf16.mxu0 %v5944_v18  ;;  %v103_v29 = vld [vmem:[%s7381_s2 + $0x18] sm:$0xff]  ;;  %v5500_v30 = vld [vmem:[%s7383_s4] ss:$0 sm:$0xff]  ;;  %s6172_s4 = smov 80   ;;  %v6453_v6 = vsub.s32 %v505_v63, %v475_v60 }
  0x53   :  { %5933 = vmatprep.subr.bf16.mxu1 %v5932_v10  ;;  %v5505_v36 = vld [vmem:[%s7385_s6] ss:$0 sm:$0xff] }
  0x54   :  { %v6429_v50 = vld [vmem:[#allocation8] ss:$0 sm:$0xff] }
  0x55   :  { %5709 = vmatmul.mubr.msk.f32.vlgmr.msra.gmra.mrb[0].mxu1 %vm115_vm0, %v93_v19  ;;  %5947 = vmatpush3.bf16.msra.mxu0 %v5944_v18 }
  0x56   :  { %5935 = vmatpush3.bf16.msra.mxu1 %v5932_v10  ;;  %5711 = vmatprep.mubr.msk.f32.mxu1 %vm115_vm0, %v94_v20 }
  0x57   :  { %5937 = vmatprep.subr.bf16.mxu1 %v5936_v21  ;;  %5752 = vmatprep.subr.mxu0 %v6173_v45 }
  0x58   :  { %5737 = vmatmul.mubr.msk.f32.vlgmr.msra.gmra.mrb[0].mxu0 %vm115_vm0, %v101_v24 }
  0x59   :  { %5712 = vmatmul.mubr.msk.f32.gmra.mrb[2].mxu1 %vm115_vm0, %v95_v22  ;;  %5739 = vmatprep.mubr.msk.f32.mxu0 %vm115_vm0, %v102_v28 }
  0x5a   :  { %5939 = vmatpush3.bf16.msra.mxu1 %v5936_v21  ;;  %5722 = vmatprep.mubr.msk.f32.mxu1 %vm115_vm0, %v96_v23 }
  0x5b   :  { %5742 = vmatprep.subr.mxu1 %v6173_v45 }
  0x5c   :  { %5740 = vmatmul.mubr.msk.f32.gmra.mrb[2].mxu0 %vm115_vm0, %v103_v29 }
  0x5d   :  { %5723 = vmatmul.mubr.msk.f32.vlgmr.msra.gmra.mrb[4].mxu1 %vm115_vm0, %v97_v25  ;;  %5754 = vmatprep.mubr.msk.f32.mxu0 %vm6174_vm1, %v6173_v45 }
  0x5e   :  { %5725 = vmatprep.mubr.msk.f32.mxu1 %vm115_vm0, %v98_v26 }
  0x61   :  { %5726 = vmatmul.mubr.msk.f32.gmra.mrb[6].mxu1 %vm115_vm0, %v99_v27 }
  0x62   :  { %5744 = vmatprep.mubr.msk.f32.mxu1 %vm6174_vm1, %v6173_v45 }
 0x128   :  { %v5710_v31 = vpop.f32.mrb[0].mxu1 }
 0x129   :  { %v194_v32 = vpop.f32.mrb[1].mxu1  ;;  %v6379_v43 = vadd.f32 %v5710_v31, %v5500_v30 }
 0x12a   :  { %v6356_v33 = vadd.f32 %v5500_v30, %v194_v32 }
 0x12b   :  { %v5738_v49 = vpop.f32.mrb[0].mxu0 }
 0x12c   :  { %v5713_v34 = vpop.f32.mrb[2].mxu1  ;;  %445 = vrot.lane.b32.xlu0 %v6356_v33, %s6170_s1  ;;  %433 = vrot.lane.b32.xlu1 %v6356_v33, %s6171_s15  ;;  %v410_v51 = vpop.f32.mrb[1].mxu0  ;;  %v6439_v53 = vadd.f32 %v5738_v49, %v6429_v50 }
 0x12d   :  { %v204_v35 = vpop.f32.mrb[3].mxu1  ;;  %v6417_v48 = vadd.f32 %v5713_v34, %v5500_v30  ;;  %v6432_v52 = vadd.f32 %v6429_v50, %v410_v51 }
 0x12e   :  { %v6389_v44 = vadd.f32 %v5500_v30, %v204_v35 }
 0x130   :  { %v5724_v37 = vpop.f32.mrb[4].mxu1  ;;  %457 = vrot.lane.b32.xlu1 %v6356_v33, %s6172_s4 }
 0x131   :  { %v6367_v38 = vadd.f32 %v5724_v37, %v5505_v36  ;;  %v302_v39 = vpop.f32.mrb[5].mxu1 }
 0x132   :  { %v6373_v41 = vadd.f32 %v5505_v36, %v302_v39 }
 0x133   :  { %1019 = vrot.lane.b32.xlu0 %v6367_v38, %s6171_s15 }
 0x134   :  { %1031 = vrot.lane.b32.xlu1 %v6367_v38, %s6170_s1  ;;  %v5727_v40 = vpop.f32.mrb[6].mxu1 }
 0x135   :  { %v312_v42 = vpop.f32.mrb[7].mxu1  ;;  %v6407_v47 = vadd.f32 %v5727_v40, %v5505_v36 }
 0x136   :  { %v6397_v46 = vadd.f32 %v5505_v36, %v312_v42 }
 0x137   :  { %1017 = vrot.lane.b32.xlu0 %v6373_v41, %s6171_s15 }
 0x138   :  { %1041 = vrot.lane.b32.xlu1 %v6373_v41, %s6172_s4 }
 0x13b   :  { %1029 = vrot.lane.b32.xlu0 %v6373_v41, %s6170_s1 }
 0x13c   :  { %435 = vrot.lane.b32.xlu1 %v6379_v43, %s6171_s15 }
 0x13f   :  { %1043 = vrot.lane.b32.xlu0 %v6367_v38, %s6172_s4 }
 0x140   :  { %459 = vrot.lane.b32.xlu1 %v6379_v43, %s6172_s4 }
 0x143   :  { %447 = vrot.lane.b32.xlu0 %v6379_v43, %s6170_s1 }
 0x144   :  { %437 = vrot.lane.b32.xlu1 %v6389_v44, %s6171_s15 }
 0x147   :  { %449 = vrot.lane.b32.xlu0 %v6389_v44, %s6170_s1 }
 0x148   :  { %461 = vrot.lane.b32.xlu1 %v6389_v44, %s6172_s4 }
 0x14b   :  { %1021 = vrot.lane.b32.xlu0 %v6397_v46, %s6171_s15 }
 0x14c   :  { %1033 = vrot.lane.b32.xlu1 %v6397_v46, %s6170_s1 }
 0x14f   :  { %1045 = vrot.lane.b32.xlu0 %v6397_v46, %s6172_s4 }
 0x150   :  { %1035 = vrot.lane.b32.xlu1 %v6407_v47, %s6170_s1 }
 0x153   :  { %1023 = vrot.lane.b32.xlu0 %v6407_v47, %s6171_s15 }
 0x154   :  { %439 = vrot.lane.b32.xlu1 %v6417_v48, %s6171_s15 }
 0x157   :  { %1047 = vrot.lane.b32.xlu0 %v6407_v47, %s6172_s4 }
 0x158   :  { %463 = vrot.lane.b32.xlu1 %v6417_v48, %s6172_s4 }
 0x15b   :  { %451 = vrot.lane.b32.xlu0 %v6417_v48, %s6170_s1 }
 0x15c   :  { %1601 = vrot.lane.b32.xlu1 %v6432_v52, %s6171_s15 }
 0x15f   :  { %1613 = vrot.lane.b32.xlu0 %v6432_v52, %s6170_s1 }
 0x160   :  { %1625 = vrot.lane.b32.xlu1 %v6432_v52, %s6172_s4 }
 0x163   :  { %1603 = vrot.lane.b32.xlu0 %v6439_v53, %s6171_s15 }
 0x164   :  { %1615 = vrot.lane.b32.xlu1 %v6439_v53, %s6170_s1 }
 0x168   :  { %1627 = vrot.lane.b32.xlu1 %v6439_v53, %s6172_s4 }
 0x19e   :  { %v446_v61 = vpop.permute.xlu0 %445  ;;  %v434_v62 = vpop.permute.xlu1 %433 }
 0x19f   :  { %v469_v1 = vcombine.low %v6356_v33, %v446_v61  ;;  %v470_v2 = vcombine.high %v6356_v33, %v446_v61 }
 0x1a1   :  { %v477_v7 = vrot.slane %v469_v1, %v6449_v0  ;;  %v484_v8 = vrot.slane %v470_v2, %v6449_v0 }
 0x1a2   :  { %v458_v3 = vpop.permute.xlu1 %457 }
 0x1a3   :  { %v485_v4 = vcombine.low %v434_v62, %v458_v3  ;;  %v486_v5 = vcombine.high %v434_v62, %v458_v3 }
 0x1a5   :  { %v493_v9 = vrot.slane %v485_v4, %v6449_v0  ;;  %v500_v10 = vrot.slane %v486_v5, %v6449_v0  ;;  %v1020_v11 = vpop.permute.xlu0 %1019 }
 0x1a6   :  { %v1032_v12 = vpop.permute.xlu1 %1031 }
 0x1a7   :  { %v501_v13 = vcombine.low %v477_v7, %v493_v9  ;;  %v502_v14 = vcombine.high %v477_v7, %v493_v9  ;;  %v517_v15 = vcombine.low %v484_v8, %v500_v10  ;;  %v518_v16 = vcombine.high %v484_v8, %v500_v10 }
 0x1a8   :  { %v1121_v27 = vcombine.low %v6367_v38, %v1032_v12  ;;  %v1122_v28 = vcombine.high %v6367_v38, %v1032_v12 }
 0x1a9   :  { %v509_v17 = vrot.slane %v501_v13, %v6453_v6  ;;  %v516_v18 = vrot.slane %v502_v14, %v6453_v6  ;;  %v525_v19 = vrot.slane %v517_v15, %v6453_v6  ;;  %v532_v20 = vrot.slane %v518_v16, %v6453_v6  ;;  %v1018_v21 = vpop.permute.xlu0 %1017 }
 0x1aa   :  { %v1042_v22 = vpop.permute.xlu1 %1041  ;;  %v1129_v57 = vrot.slane %v1121_v27, %v6449_v0  ;;  %v1136_v58 = vrot.slane %v1122_v28, %v6449_v0 }
 0x1ab   :  { %v741_v23 = vcombine.low %v509_v17, %v516_v18  ;;  %v5515_v24 = vcombine.high %v509_v17, %v516_v18  ;;  %v757_v25 = vcombine.low %v525_v19, %v532_v20  ;;  %v5516_v26 = vcombine.high %v525_v19, %v532_v20 }
 0x1ac   :  { %v1069_v29 = vcombine.low %v1018_v21, %v1042_v22  ;;  %v1070_v30 = vcombine.high %v1018_v21, %v1042_v22 }
 0x1ad   :  { %v748_v31 = vrot.slane %v741_v23, %v6449_v0  ;;  %v756_v32 = vrot.slane %v5515_v24, %v6449_v0  ;;  %v764_v33 = vrot.slane %v757_v25, %v6449_v0  ;;  %v772_v34 = vrot.slane %v5516_v26, %v6449_v0  ;;  %v1030_v35 = vpop.permute.xlu0 %1029 }
 0x1ae   :  { %v1053_v36 = vcombine.low %v6373_v41, %v1030_v35  ;;  %v1054_v37 = vcombine.high %v6373_v41, %v1030_v35  ;;  %v436_v39 = vpop.permute.xlu1 %435  ;;  %v1077_v38 = vrot.slane %v1069_v29, %v6449_v0  ;;  %v1084_v49 = vrot.slane %v1070_v30, %v6449_v0 }
 0x1af   :  { %v773_v40 = vcombine.low %v748_v31, %v756_v32  ;;  %v774_v42 = vcombine.high %v748_v31, %v756_v32  ;;  %v789_v55 = vcombine.low %v764_v33, %v772_v34  ;;  %v790_v56 = vcombine.high %v764_v33, %v772_v34 }
 0x1b0   :  { %v1061_v51 = vrot.slane %v1053_v36, %v6449_v0  ;;  %v1068_v54 = vrot.slane %v1054_v37, %v6449_v0 }
 0x1b1   :  { %v1044_v59 = vpop.permute.xlu0 %1043  ;;  %v6478_v1 = vrot.slane %v773_v40, %v6453_v6  ;;  %v6481_v2 = vrot.slane %v774_v42, %v6453_v6  ;;  %v6490_v24 = vrot.slane %v789_v55, %v6453_v6  ;;  %v6493_v25 = vrot.slane %v790_v56, %v6453_v6 }
 0x1b2   :  { %v1085_v60 = vcombine.low %v1061_v51, %v1077_v38  ;;  %v1086_v41 = vcombine.high %v1061_v51, %v1077_v38  ;;  %v1101_v61 = vcombine.low %v1068_v54, %v1084_v49  ;;  %v1102_v62 = vcombine.high %v1068_v54, %v1084_v49  ;;  %v460_v63 = vpop.permute.xlu1 %459 }
 0x1b3   :  { %v1137_v3 = vcombine.low %v1020_v11, %v1044_v59  ;;  %v1138_v4 = vcombine.high %v1020_v11, %v1044_v59  ;;  %v553_v13 = vcombine.low %v436_v39, %v460_v63  ;;  %v554_v14 = vcombine.high %v436_v39, %v460_v63 }
 0x1b4   :  { %v1093_v5 = vrot.slane %v1085_v60, %v6453_v6  ;;  %v1100_v7 = vrot.slane %v1086_v41, %v6453_v6  ;;  %v1109_v8 = vrot.slane %v1101_v61, %v6453_v6  ;;  %v1116_v9 = vrot.slane %v1102_v62, %v6453_v6 }
 0x1b5   :  { %v1145_v10 = vrot.slane %v1137_v3, %v6449_v0  ;;  %v1152_v12 = vrot.slane %v1138_v4, %v6449_v0  ;;  %v448_v15 = vpop.permute.xlu0 %447  ;;  %v561_v35 = vrot.slane %v553_v13, %v6449_v0  ;;  %v568_v36 = vrot.slane %v554_v14, %v6449_v0 }
 0x1b6   :  { %v1325_v16 = vcombine.low %v1093_v5, %v1100_v7  ;;  %v5523_v17 = vcombine.high %v1093_v5, %v1100_v7  ;;  %v1341_v18 = vcombine.low %v1109_v8, %v1116_v9  ;;  %v5524_v19 = vcombine.high %v1109_v8, %v1116_v9  ;;  %v438_v11 = vpop.permute.xlu1 %437 }
 0x1b7   :  { %v1153_v20 = vcombine.low %v1129_v57, %v1145_v10  ;;  %v1154_v21 = vcombine.high %v1129_v57, %v1145_v10  ;;  %v1169_v22 = vcombine.low %v1136_v58, %v1152_v12  ;;  %v1170_v23 = vcombine.high %v1136_v58, %v1152_v12 }
 0x1b8   :  { %v6496_v26 = vrot.slane %v1325_v16, %v6449_v0  ;;  %v6499_v27 = vrot.slane %v5523_v17, %v6449_v0  ;;  %v6506_v33 = vrot.slane %v1341_v18, %v6449_v0  ;;  %v6509_v34 = vrot.slane %v5524_v19, %v6449_v0 }
 0x1b9   :  { %v1161_v28 = vrot.slane %v1153_v20, %v6453_v6  ;;  %v1168_v29 = vrot.slane %v1154_v21, %v6453_v6  ;;  %v1177_v30 = vrot.slane %v1169_v22, %v6453_v6  ;;  %v1184_v31 = vrot.slane %v1170_v23, %v6453_v6  ;;  %v450_v32 = vpop.permute.xlu0 %449 }
 0x1ba   :  { %v462_v37 = vpop.permute.xlu1 %461  ;;  %v537_v49 = vcombine.low %v6379_v43, %v448_v15  ;;  %v538_v51 = vcombine.high %v6379_v43, %v448_v15  ;;  %v605_v54 = vcombine.low %v6389_v44, %v450_v32  ;;  %v606_v55 = vcombine.high %v6389_v44, %v450_v32 }
 0x1bb   :  { %v1393_v39 = vcombine.low %v1161_v28, %v1168_v29  ;;  %v5525_v40 = vcombine.high %v1161_v28, %v1168_v29  ;;  %v1409_v42 = vcombine.low %v1177_v30, %v1184_v31  ;;  %v5526_v38 = vcombine.high %v1177_v30, %v1184_v31 }
 0x1bc   :  { %v1357_v56 = vcombine.low %v6496_v26, %v6499_v27  ;;  %v1358_v57 = vcombine.high %v6496_v26, %v6499_v27  ;;  %v1373_v60 = vcombine.low %v6506_v33, %v6509_v34  ;;  %v1374_v43 = vcombine.high %v6506_v33, %v6509_v34 }
 0x1bd   :  { %v6522_v58 = vrot.slane %v1393_v39, %v6449_v0  ;;  %v6525_v59 = vrot.slane %v5525_v40, %v6449_v0  ;;  %v545_v44 = vrot.slane %v537_v49, %v6449_v0  ;;  %v552_v41 = vrot.slane %v538_v51, %v6449_v0  ;;  %v1022_v15 = vpop.permute.xlu0 %1021 }
 0x1be   :  { %v6534_v61 = vrot.slane %v1409_v42, %v6449_v0  ;;  %v6537_v62 = vrot.slane %v5526_v38, %v6449_v0  ;;  %v613_v63 = vrot.slane %v605_v54, %v6449_v0  ;;  %v620_v3 = vrot.slane %v606_v55, %v6449_v0  ;;  %v1034_v9 = vpop.permute.xlu1 %1033 }
 0x1bf   :  { %v569_v4 = vcombine.low %v545_v44, %v561_v35  ;;  %v570_v5 = vcombine.high %v545_v44, %v561_v35  ;;  %v585_v7 = vcombine.low %v552_v41, %v568_v36  ;;  %v586_v8 = vcombine.high %v552_v41, %v568_v36 }
 0x1c0   :  { %v1425_v10 = vcombine.low %v6522_v58, %v6525_v59  ;;  %v1426_v12 = vcombine.high %v6522_v58, %v6525_v59  ;;  %v621_v13 = vcombine.low %v438_v11, %v462_v37  ;;  %v622_v14 = vcombine.high %v438_v11, %v462_v37 }
 0x1c1   :  { %v577_v16 = vrot.slane %v569_v4, %v6453_v6  ;;  %v584_v17 = vrot.slane %v570_v5, %v6453_v6  ;;  %v593_v18 = vrot.slane %v585_v7, %v6453_v6  ;;  %v600_v19 = vrot.slane %v586_v8, %v6453_v6  ;;  %v1046_v42 = vpop.permute.xlu0 %1045 }
 0x1c2   :  { %v629_v20 = vrot.slane %v621_v13, %v6449_v0  ;;  %v636_v21 = vrot.slane %v622_v14, %v6449_v0  ;;  %v1189_v22 = vcombine.low %v6397_v46, %v1034_v9  ;;  %v1190_v23 = vcombine.high %v6397_v46, %v1034_v9  ;;  %v6583_v8 = vpop.permute.xlu1 %1035 }
 0x1c3   :  { %v809_v26 = vcombine.low %v577_v16, %v584_v17  ;;  %v5517_v11 = vcombine.high %v577_v16, %v584_v17  ;;  %v825_v27 = vcombine.low %v593_v18, %v600_v19  ;;  %v5518_v28 = vcombine.high %v593_v18, %v600_v19 }
 0x1c4   :  { %v637_v29 = vcombine.low %v613_v63, %v629_v20  ;;  %v638_v30 = vcombine.high %v613_v63, %v629_v20  ;;  %v653_v31 = vcombine.low %v620_v3, %v636_v21  ;;  %v654_v32 = vcombine.high %v620_v3, %v636_v21 }
 0x1c5   :  { %v1441_v33 = vcombine.low %v6534_v61, %v6537_v62  ;;  %v1442_v34 = vcombine.high %v6534_v61, %v6537_v62  ;;  %v6558_v35 = vrot.slane %v809_v26, %v6449_v0  ;;  %v6561_v46 = vrot.slane %v5517_v11, %v6449_v0  ;;  %v6607_v21 = vpop.permute.xlu0 %1023 }
 0x1c6   :  { %v645_v36 = vrot.slane %v637_v29, %v6453_v6  ;;  %v652_v37 = vrot.slane %v638_v30, %v6453_v6  ;;  %v661_v39 = vrot.slane %v653_v31, %v6453_v6  ;;  %v668_v40 = vrot.slane %v654_v32, %v6453_v6  ;;  %v440_v32 = vpop.permute.xlu1 %439 }
 0x1c7   :  { %v6568_v38 = vrot.slane %v825_v27, %v6449_v0  ;;  %v6571_v49 = vrot.slane %v5518_v28, %v6449_v0  ;;  %v1197_v51 = vrot.slane %v1189_v22, %v6449_v0  ;;  %v1204_v54 = vrot.slane %v1190_v23, %v6449_v0 }
 0x1c8   :  { %v877_v55 = vcombine.low %v645_v36, %v652_v37  ;;  %v5519_v44 = vcombine.high %v645_v36, %v652_v37  ;;  %v893_v41 = vcombine.low %v661_v39, %v668_v40  ;;  %v5520_v63 = vcombine.high %v661_v39, %v668_v40 }
 0x1c9   :  { %v1365_v3 = vrot.slane %v1357_v56, %v6453_v6  ;;  %v1381_v4 = vrot.slane %v1373_v60, %v6453_v6  ;;  %v6578_v5 = vrot.slane %v1358_v57, %v6453_v6  ;;  %v6581_v7 = vrot.slane %v1374_v43, %v6453_v6 }
 0x1ca   :  { %v841_v9 = vcombine.low %v6558_v35, %v6561_v46  ;;  %v842_v13 = vcombine.high %v6558_v35, %v6561_v46  ;;  %v6590_v14 = vrot.slane %v877_v55, %v6449_v0  ;;  %v6593_v56 = vrot.slane %v5519_v44, %v6449_v0 }
 0x1cb   :  { %v1389_v60 = vcombine.low %v1365_v3, %v1381_v4  ;;  %v1391_v57 = vcombine.low %v6578_v5, %v6581_v7  ;;  %v1205_v43 = vcombine.low %v1022_v15, %v1046_v42  ;;  %v1206_v16 = vcombine.high %v1022_v15, %v1046_v42 }
 0x1cc   :  { %v857_v17 = vcombine.low %v6568_v38, %v6571_v49  ;;  %v858_v18 = vcombine.high %v6568_v38, %v6571_v49  ;;  %v6602_v19 = vrot.slane %v893_v41, %v6449_v0  ;;  %v6605_v20 = vrot.slane %v5520_v63, %v6449_v0  ;;  %v1048_v41 = vpop.permute.xlu0 %1047 }
 0x1cd   :  { %v909_v22 = vcombine.low %v6590_v14, %v6593_v56  ;;  %5743 = vmatpush3.xpose.msk.msra.mxu1 %vm2181_vm2, %v1389_v60  ;;  %5753 = vmatpush3.xpose.msk.msra.mxu0 %vm2181_vm2, %v1391_v57  ;;  %v1213_v15 = vrot.slane %v1205_v43, %v6449_v0  ;;  %v1220_v23 = vrot.slane %v1206_v16, %v6449_v0 }
 0x1ce   :  { %v910_v26 = vcombine.high %v6590_v14, %v6593_v56  ;;  %v805_v11 = vcombine.low %v6478_v1, %v6490_v24  ;;  %5747 = vmatprep.subr.mxu1 %v6173_v45  ;;  %v807_v27 = vcombine.low %v6481_v2, %v6493_v25  ;;  %5762 = vmatprep.subr.mxu0 %v6173_v45 }
 0x1cf   :  { %v1221_v28 = vcombine.low %v1197_v51, %v1213_v15  ;;  %v1222_v29 = vcombine.high %v1197_v51, %v1213_v15  ;;  %v1237_v30 = vcombine.low %v1204_v54, %v1220_v23  ;;  %v1238_v31 = vcombine.high %v1204_v54, %v1220_v23  ;;  %v464_v15 = vpop.permute.xlu1 %463 }
 0x1d0   :  { %v1257_v36 = vcombine.low %v6407_v47, %v6583_v8  ;;  %v1258_v37 = vcombine.high %v6407_v47, %v6583_v8  ;;  %5745 = vmatmul.mubr.msk.f32.vlgmr.msra.gmra.mrb[8].mxu1 %vm2181_vm2, %v805_v11  ;;  %5755 = vmatmul.mubr.msk.f32.vlgmr.msra.gmra.mrb[4].mxu0 %vm2181_vm2, %v807_v27  ;;  %v1390_v39 = vcombine.high %v1365_v3, %v1381_v4 }
 0x1d1   :  { %v1229_v40 = vrot.slane %v1221_v28, %v6453_v6  ;;  %v1236_v42 = vrot.slane %v1222_v29, %v6453_v6  ;;  %v1245_v51 = vrot.slane %v1237_v30, %v6453_v6  ;;  %v1252_v54 = vrot.slane %v1238_v31, %v6453_v6  ;;  %5749 = vmatprep.mubr.msk.f32.mxu1 %vm6174_vm1, %v6173_v45 }
 0x1d2   :  { %5748 = vmatpush3.xpose.msk.msra.mxu1 %vm2181_vm2, %v1390_v39  ;;  %v1433_v47 = vrot.slane %v1425_v10, %v6453_v6  ;;  %v1449_v55 = vrot.slane %v1441_v33, %v6453_v6  ;;  %v806_v44 = vcombine.high %v6478_v1, %v6490_v24  ;;  %5764 = vmatprep.mubr.msk.f32.mxu0 %vm6174_vm1, %v6173_v45 }
 0x1d3   :  { %v1461_v63 = vcombine.low %v1229_v40, %v1236_v42  ;;  %v5527_v3 = vcombine.high %v1229_v40, %v1236_v42  ;;  %v1477_v4 = vcombine.low %v1245_v51, %v1252_v54  ;;  %v5528_v8 = vcombine.high %v1245_v51, %v1252_v54  ;;  %5757 = vmatprep.subr.mxu1 %v6173_v45 }
 0x1d4   :  { %v1457_v60 = vcombine.low %v1433_v47, %v1449_v55  ;;  %v1392_v57 = vcombine.high %v6578_v5, %v6581_v7  ;;  %v849_v10 = vrot.slane %v841_v9, %v6453_v6  ;;  %v865_v33 = vrot.slane %v857_v17, %v6453_v6 }
 0x1d5   :  { %v6651_v1 = vrot.slane %v1461_v63, %v6449_v0  ;;  %v6654_v24 = vrot.slane %v5527_v3, %v6449_v0  ;;  %v6657_v43 = vrot.slane %v1477_v4, %v6449_v0  ;;  %v6660_v16 = vrot.slane %v5528_v8, %v6449_v0  ;;  %5750 = vmatmul.mubr.msk.f32.vlgmr.msra.gmra.mrb[10].mxu1 %vm2181_vm2, %v806_v44 }
 0x1d6   :  { %5763 = vmatpush3.xpose.msk.msra.mxu0 %vm2181_vm2, %v1457_v60  ;;  %5758 = vmatpush3.xpose.msk.msra.mxu1 %vm2181_vm2, %v1392_v57  ;;  %v873_v5 = vcombine.low %v849_v10, %v865_v33  ;;  %v6669_v7 = vrot.slane %v1426_v12, %v6453_v6  ;;  %v6675_v9 = vrot.slane %v1442_v34, %v6453_v6  ;;  %v452_v12 = vpop.permute.xlu0 %451 }
 0x1d7   :  { %v1493_v17 = vcombine.low %v6651_v1, %v6654_v24  ;;  %v1509_v23 = vcombine.low %v6657_v43, %v6660_v16  ;;  %v1265_v11 = vrot.slane %v1257_v36, %v6449_v0  ;;  %v1272_v27 = vrot.slane %v1258_v37, %v6449_v0  ;;  %5772 = vmatprep.subr.mxu0 %v6173_v45 }
 0x1d8   :  { %v1459_v58 = vcombine.low %v6669_v7, %v6675_v9  ;;  %v1273_v59 = vcombine.low %v6607_v21, %v1048_v41  ;;  %v1274_v61 = vcombine.high %v6607_v21, %v1048_v41  ;;  %5759 = vmatprep.mubr.msk.f32.mxu1 %vm6174_vm1, %v6173_v45  ;;  %v689_v62 = vcombine.low %v440_v32, %v464_v15 }
 0x1d9   :  { %5765 = vmatmul.mubr.msk.f32.vlgmr.msra.gmra.mrb[6].mxu0 %vm2181_vm2, %v873_v5  ;;  %v690_v34 = vcombine.high %v440_v32, %v464_v15  ;;  %v808_v28 = vcombine.high %v6481_v2, %v6493_v25  ;;  %5767 = vmatprep.subr.mxu1 %v6173_v45  ;;  %v1458_v29 = vcombine.high %v1433_v47, %v1449_v55 }
 0x1da   :  { %5773 = vmatpush3.xpose.msk.msra.mxu0 %vm2181_vm2, %v1459_v58  ;;  %v1281_v30 = vrot.slane %v1273_v59, %v6449_v0  ;;  %v1288_v21 = vrot.slane %v1274_v61, %v6449_v0  ;;  %v697_v31 = vrot.slane %v689_v62, %v6449_v0  ;;  %5774 = vmatprep.mubr.msk.f32.mxu0 %vm6174_vm1, %v6173_v45 }
 0x1db   :  { %v704_v36 = vrot.slane %v690_v34, %v6449_v0  ;;  %5760 = vmatmul.mubr.msk.f32.vlgmr.msra.gmra.mrb[12].mxu1 %vm2181_vm2, %v808_v28  ;;  %v6706_v2 = vrot.slane %v842_v13, %v6453_v6  ;;  %v6712_v25 = vrot.slane %v858_v18, %v6453_v6  ;;  %v673_v32 = vcombine.low %v6417_v48, %v452_v12 }
 0x1dc   :  { %v1289_v37 = vcombine.low %v1265_v11, %v1281_v30  ;;  %v1290_v39 = vcombine.high %v1265_v11, %v1281_v30  ;;  %v1305_v40 = vcombine.low %v1272_v27, %v1288_v21  ;;  %v1306_v42 = vcombine.high %v1272_v27, %v1288_v21  ;;  %5768 = vmatpush3.xpose.msk.msra.mxu1 %vm2181_vm2, %v1458_v29 }
 0x1dd   :  { %v875_v51 = vcombine.low %v6706_v2, %v6712_v25  ;;  %v674_v35 = vcombine.high %v6417_v48, %v452_v12  ;;  %v681_v46 = vrot.slane %v673_v32, %v6449_v0  ;;  %5769 = vmatprep.mubr.msk.f32.mxu1 %vm6174_vm1, %v6173_v45  ;;  %v874_v38 = vcombine.high %v849_v10, %v865_v33 }
 0x1de   :  { %v1297_v49 = vrot.slane %v1289_v37, %v6453_v6  ;;  %v1304_v13 = vrot.slane %v1290_v39, %v6453_v6  ;;  %v1313_v18 = vrot.slane %v1305_v40, %v6453_v6  ;;  %v1320_v54 = vrot.slane %v1306_v42, %v6453_v6  ;;  %5777 = vmatprep.subr.mxu1 %v6173_v45 }
 0x1df   :  { %5775 = vmatmul.mubr.msk.f32.vlgmr.msra.gmra.mrb[8].mxu0 %vm2181_vm2, %v875_v51  ;;  %v688_v48 = vrot.slane %v674_v35, %v6449_v0  ;;  %v705_v47 = vcombine.low %v681_v46, %v697_v31  ;;  %v706_v55 = vcombine.high %v681_v46, %v697_v31  ;;  %5770 = vmatmul.mubr.msk.f32.vlgmr.msra.gmra.mrb[14].mxu1 %vm2181_vm2, %v874_v38 }
 0x1e0   :  { %v1529_v44 = vcombine.low %v1297_v49, %v1304_v13  ;;  %v5529_v41 = vcombine.high %v1297_v49, %v1304_v13  ;;  %v1545_v63 = vcombine.low %v1313_v18, %v1320_v54  ;;  %v5530_v3 = vcombine.high %v1313_v18, %v1320_v54  ;;  %5779 = vmatprep.mubr.msk.f32.mxu1 %vm6174_vm1, %v6173_v45 }
 0x1e1   :  { %v713_v4 = vrot.slane %v705_v47, %v6453_v6  ;;  %v720_v8 = vrot.slane %v706_v55, %v6453_v6  ;;  %v721_v60 = vcombine.low %v688_v48, %v704_v36  ;;  %v722_v57 = vcombine.high %v688_v48, %v704_v36  ;;  %5782 = vmatprep.subr.mxu0 %v6173_v45 }
 0x1e2   :  { %v6736_v10 = vrot.slane %v1529_v44, %v6449_v0  ;;  %v6739_v33 = vrot.slane %v5529_v41, %v6449_v0  ;;  %v6742_v15 = vrot.slane %v1545_v63, %v6449_v0  ;;  %v6745_v5 = vrot.slane %v5530_v3, %v6449_v0  ;;  %5784 = vmatprep.mubr.msk.f32.mxu0 %vm6174_vm1, %v6173_v45  ;;  %v1602_v3 = vpop.permute.xlu1 %1601 }
 0x1e3   :  { %v729_v11 = vrot.slane %v721_v60, %v6453_v6  ;;  %v736_v27 = vrot.slane %v722_v57, %v6453_v6  ;;  %v945_v58 = vcombine.low %v713_v4, %v720_v8  ;;  %v5521_v59 = vcombine.high %v713_v4, %v720_v8  ;;  %v1614_v4 = vpop.permute.xlu0 %1613 }
 0x1e4   :  { %v925_v61 = vcombine.low %v6602_v19, %v6605_v20  ;;  %v926_v62 = vcombine.high %v6602_v19, %v6605_v20  ;;  %v1494_v12 = vcombine.high %v6651_v1, %v6654_v24  ;;  %v1510_v34 = vcombine.high %v6657_v43, %v6660_v16 }
 0x1e5   :  { %v6760_v28 = vrot.slane %v945_v58, %v6449_v0  ;;  %v6763_v29 = vrot.slane %v5521_v59, %v6449_v0  ;;  %v961_v30 = vcombine.low %v729_v11, %v736_v27  ;;  %v5522_v21 = vcombine.high %v729_v11, %v736_v27 }
 0x1e6   :  { %v1561_v31 = vcombine.low %v6736_v10, %v6739_v33  ;;  %v1460_v19 = vcombine.high %v6669_v7, %v6675_v9  ;;  %v1501_v20 = vrot.slane %v1493_v17, %v6453_v6  ;;  %v1517_v36 = vrot.slane %v1509_v23, %v6453_v6  ;;  %v1626_v11 = vpop.permute.xlu1 %1625 }
 0x1e7   :  { %v1577_v32 = vcombine.low %v6742_v15, %v6745_v5  ;;  %v968_v37 = vrot.slane %v961_v30, %v6449_v0  ;;  %v976_v39 = vrot.slane %v5522_v21, %v6449_v0  ;;  %v876_v7 = vcombine.high %v6706_v2, %v6712_v25 }
 0x1e8   :  { %5778 = vmatpush3.xpose.msk.msra.mxu1 %vm2181_vm2, %v1460_v19  ;;  %v1525_v9 = vcombine.low %v1501_v20, %v1517_v36  ;;  %v1526_v1 = vcombine.high %v1501_v20, %v1517_v36  ;;  %v917_v24 = vrot.slane %v909_v22, %v6453_v6  ;;  %v933_v43 = vrot.slane %v925_v61, %v6453_v6  ;;  %v6848_v61 = vpop.f32.mrb[2].mxu0 }
 0x1e9   :  { %v977_v16 = vcombine.low %v6760_v28, %v6763_v29  ;;  %v993_v17 = vcombine.low %v968_v37, %v976_v39  ;;  %5787 = vmatprep.subr.mxu1 %v6173_v45  ;;  %v1508_v23 = vrot.slane %v1494_v12, %v6453_v6  ;;  %v1524_v2 = vrot.slane %v1510_v34, %v6453_v6  ;;  %v420_v12 = vpop.f32.mrb[3].mxu0 }
 0x1ea   :  { %v1562_v25 = vcombine.high %v6736_v10, %v6739_v33  ;;  %5783 = vmatpush3.xpose.msk.msra.mxu0 %vm2181_vm2, %v1525_v9  ;;  %v941_v40 = vcombine.low %v917_v24, %v933_v43  ;;  %v924_v22 = vrot.slane %v910_v26, %v6453_v6  ;;  %v940_v42 = vrot.slane %v926_v62, %v6453_v6 }
 0x1eb   :  { %5780 = vmatmul.mubr.msk.f32.vlgmr.msra.gmra.mrb[16].mxu1 %vm2181_vm2, %v876_v7  ;;  %5792 = vmatprep.subr.mxu0 %v6173_v45  ;;  %v1569_v51 = vrot.slane %v1561_v31, %v6453_v6  ;;  %v1578_v35 = vcombine.high %v6742_v15, %v6745_v5  ;;  %v1527_v46 = vcombine.low %v1508_v23, %v1524_v2 }
 0x1ec   :  { %5788 = vmatpush3.xpose.msk.msra.mxu1 %vm2181_vm2, %v1526_v1  ;;  %5789 = vmatprep.mubr.msk.f32.mxu1 %vm6174_vm1, %v6173_v45  ;;  %v1585_v38 = vrot.slane %v1577_v32, %v6453_v6  ;;  %v942_v49 = vcombine.high %v917_v24, %v933_v43  ;;  %v985_v14 = vrot.slane %v977_v16, %v6453_v6 }
 0x1ed   :  { %5785 = vmatmul.mubr.msk.f32.vlgmr.msra.gmra.mrb[10].mxu0 %vm2181_vm2, %v941_v40  ;;  %5797 = vmatprep.subr.mxu1 %v6173_v45  ;;  %v1001_v56 = vrot.slane %v993_v17, %v6453_v6  ;;  %v1528_v26 = vcombine.high %v1508_v23, %v1524_v2  ;;  %v978_v18 = vcombine.high %v6760_v28, %v6763_v29 }
 0x1ee   :  { %5793 = vmatpush3.xpose.msk.msra.mxu0 %vm2181_vm2, %v1527_v46  ;;  %5794 = vmatprep.mubr.msk.f32.mxu0 %vm6174_vm1, %v6173_v45  ;;  %v1593_v13 = vcombine.low %v1569_v51, %v1585_v38  ;;  %v994_v54 = vcombine.high %v968_v37, %v976_v39  ;;  %v943_v48 = vcombine.low %v924_v22, %v940_v42 }
 0x1ef   :  { %5790 = vmatmul.mubr.msk.f32.vlgmr.msra.gmra.mrb[18].mxu1 %vm2181_vm2, %v942_v49  ;;  %5802 = vmatprep.subr.mxu0 %v6173_v45  ;;  %v1594_v47 = vcombine.high %v1569_v51, %v1585_v38  ;;  %v1576_v55 = vrot.slane %v1562_v25, %v6453_v6  ;;  %v1592_v44 = vrot.slane %v1578_v35, %v6453_v6 }
 0x1f0   :  { %5798 = vmatpush3.xpose.msk.msra.mxu1 %vm2181_vm2, %v1528_v26  ;;  %5799 = vmatprep.mubr.msk.f32.mxu1 %vm6174_vm1, %v6173_v45  ;;  %v944_v41 = vcombine.high %v924_v22, %v940_v42  ;;  %v1009_v63 = vcombine.low %v985_v14, %v1001_v56  ;;  %v1010_v8 = vcombine.high %v985_v14, %v1001_v56 }
 0x1f1   :  { %5795 = vmatmul.mubr.msk.f32.vlgmr.msra.gmra.mrb[12].mxu0 %vm2181_vm2, %v943_v48  ;;  %5807 = vmatprep.subr.mxu1 %v6173_v45  ;;  %v1637_v60 = vcombine.low %v6432_v52, %v1614_v4  ;;  %v992_v57 = vrot.slane %v978_v18, %v6453_v6  ;;  %v1008_v10 = vrot.slane %v994_v54, %v6453_v6 }
 0x1f2   :  { %5803 = vmatpush3.xpose.msk.msra.mxu0 %vm2181_vm2, %v1593_v13  ;;  %5804 = vmatprep.mubr.msk.f32.mxu0 %vm6174_vm1, %v6173_v45  ;;  %v1638_v33 = vcombine.high %v6432_v52, %v1614_v4  ;;  %v1595_v15 = vcombine.low %v1576_v55, %v1592_v44  ;;  %v1596_v5 = vcombine.high %v1576_v55, %v1592_v44 }
 0x1f3   :  { %5800 = vmatmul.mubr.msk.f32.vlgmr.msra.gmra.mrb[20].mxu1 %vm2181_vm2, %v944_v41  ;;  %5812 = vmatprep.subr.mxu0 %v6173_v45  ;;  %v1645_v27 = vrot.slane %v1637_v60, %v6449_v0  ;;  %v1653_v52 = vcombine.low %v1602_v3, %v1626_v11  ;;  %v1654_v58 = vcombine.high %v1602_v3, %v1626_v11 }
 0x1f4   :  { %5808 = vmatpush3.xpose.msk.msra.mxu1 %vm2181_vm2, %v1594_v47  ;;  %5809 = vmatprep.mubr.msk.f32.mxu1 %vm6174_vm1, %v6173_v45  ;;  %v1652_v59 = vrot.slane %v1638_v33, %v6449_v0  ;;  %v1011_v62 = vcombine.low %v992_v57, %v1008_v10  ;;  %v6858_v29 = vadd.f32 %v6429_v50, %v420_v12 }
 0x1f5   :  { %5817 = vmatprep.subr.mxu1 %v6173_v45  ;;  %5805 = vmatmul.mubr.msk.f32.vlgmr.msra.gmra.mrb[14].mxu0 %vm2181_vm2, %v1009_v63  ;;  %v1661_v34 = vrot.slane %v1653_v52, %v6449_v0  ;;  %v1668_v28 = vrot.slane %v1654_v58, %v6449_v0  ;;  %v1012_v30 = vcombine.high %v992_v57, %v1008_v10 }
 0x1f6   :  { %5813 = vmatpush3.xpose.msk.msra.mxu0 %vm2181_vm2, %v1595_v15  ;;  %5814 = vmatprep.mubr.msk.f32.mxu0 %vm6174_vm1, %v6173_v45 }
 0x1f7   :  { %5810 = vmatmul.mubr.msk.f32.vlgmr.msra.gmra.mrb[22].mxu1 %vm2181_vm2, %v1010_v8  ;;  %5822 = vmatprep.subr.mxu0 %v6173_v45  ;;  %v1669_v21 = vcombine.low %v1645_v27, %v1661_v34  ;;  %v1670_v31 = vcombine.high %v1645_v27, %v1661_v34  ;;  %v1685_v19 = vcombine.low %v1652_v59, %v1668_v28 }
 0x1f8   :  { %5818 = vmatpush3.xpose.msk.msra.mxu1 %vm2181_vm2, %v1596_v5  ;;  %5819 = vmatprep.mubr.msk.f32.mxu1 %vm6174_vm1, %v6173_v45  ;;  %v1686_v20 = vcombine.high %v1652_v59, %v1668_v28 }
 0x1f9   :  { %5815 = vmatmul.mubr.msk.f32.vlgmr.msra.gmra.mrb[16].mxu0 %vm2181_vm2, %v1011_v62  ;;  %5827 = vmatprep.subr.mxu1 %v6173_v45  ;;  %v1677_v50 = vrot.slane %v1669_v21, %v6453_v6  ;;  %v1684_v36 = vrot.slane %v1670_v31, %v6453_v6  ;;  %v1693_v32 = vrot.slane %v1685_v19, %v6453_v6 }
 0x1fa   :  { %1605 = vrot.lane.b32.xlu1 %v6858_v29, %s6171_s15  ;;  %5824 = vmatprep.mubr.msk.f32.mxu0 %vm6174_vm1, %v6173_v45  ;;  %v1700_v37 = vrot.slane %v1686_v20, %v6453_v6 }
 0x1fb   :  { %5820 = vmatmul.mubr.msk.f32.vlgmr.msra.gmra.mrb[24].mxu1 %vm2181_vm2, %v1012_v30  ;;  %v1909_v39 = vcombine.low %v1677_v50, %v1684_v36  ;;  %v5531_v7 = vcombine.high %v1677_v50, %v1684_v36 }
 0x1fc   :  { %5829 = vmatprep.mubr.msk.f32.mxu1 %vm6174_vm1, %v6173_v45  ;;  %v1925_v9 = vcombine.low %v1693_v32, %v1700_v37  ;;  %v5532_v1 = vcombine.high %v1693_v32, %v1700_v37 }
 0x1fd   :  { %v1916_v24 = vrot.slane %v1909_v39, %v6449_v0  ;;  %v1924_v43 = vrot.slane %v5531_v7, %v6449_v0 }
 0x1fe   :  { %v1932_v16 = vrot.slane %v1925_v9, %v6449_v0  ;;  %v1940_v17 = vrot.slane %v5532_v1, %v6449_v0 }
 0x1ff   :  { %v1941_v23 = vcombine.low %v1916_v24, %v1924_v43  ;;  %v1942_v51 = vcombine.high %v1916_v24, %v1924_v43 }
 0x200   :  { %v1957_v2 = vcombine.low %v1932_v16, %v1940_v17  ;;  %v1958_v35 = vcombine.high %v1932_v16, %v1940_v17 }
 0x201   :  { %v1949_v25 = vrot.slane %v1941_v23, %v6453_v6  ;;  %v6882_v46 = vrot.slane %v1942_v51, %v6453_v6 }
 0x202   :  { %v1965_v40 = vrot.slane %v1957_v2, %v6453_v6  ;;  %v6885_v38 = vrot.slane %v1958_v35, %v6453_v6 }
 0x204   :  { %v1973_v22 = vcombine.low %v1949_v25, %v1965_v40  ;;  %v1974_v42 = vcombine.high %v1949_v25, %v1965_v40  ;;  %v1975_v49 = vcombine.low %v6882_v46, %v6885_v38  ;;  %v1976_v14 = vcombine.high %v6882_v46, %v6885_v38 }
 0x206   :  { %5823 = vmatpush3.msra.mxu0 %v1973_v22  ;;  %5828 = vmatpush3.msra.mxu1 %v1974_v42 }
 0x207   :  { %5832 = vmatprep.subr.mxu0 %v6173_v45  ;;  %5837 = vmatprep.subr.mxu1 %v6173_v45 }
 0x2a3   :  { %v2254_v56 = vpop.f32.mrb[8].mxu1  ;;  %v2406_v26 = vpop.f32.mrb[4].mxu0 }
 0x2a4   :  { %v6891_v13 = vmul.f32 0.25, %v2254_v56  ;;  %v5746_v18 = vpop.f32.mrb[9].mxu1  ;;  %v5756_v54 = vpop.f32.mrb[5].mxu0  ;;  %v6893_v48 = vmul.f32 0.25, %v2406_v26 }
 0x2a6   :  { %v3415_v47 = vsel %vm3414_vm3, %v6891_v13, -inf  ;;  %v3421_v63 = vsel %vm3414_vm3, %v6893_v48, -inf }
 0x2a7   :  { %3416 = vmax.xlane.f32.xlu0 %v3415_v47 }
 0x2a8   :  { %v2330_v55 = vpop.f32.mrb[10].mxu1 }
 0x2a9   :  { %v6897_v44 = vmul.f32 0.25, %v2330_v55  ;;  %v5751_v41 = vpop.f32.mrb[11].mxu1 }
 0x2ab   :  { %3422 = vmax.xlane.f32.xlu0 %v3421_v63  ;;  %v3418_v3 = vsel %vm3414_vm3, %v6897_v44, -inf }
 0x2ac   :  { %v2558_v4 = vpop.f32.mrb[6].mxu0  ;;  %3419 = vmax.xlane.f32.xlu1 %v3418_v3 }
 0x2ad   :  { %v6903_v8 = vmul.f32 0.25, %v2558_v4  ;;  %v5766_v60 = vpop.f32.mrb[7].mxu0 }
 0x2ae   :  { %v2482_v57 = vpop.f32.mrb[12].mxu1  ;;  %v6959_v60 = vpop.permute.xlu1 %1615 }
 0x2af   :  { %v6905_v10 = vmul.f32 0.25, %v2482_v57  ;;  %v5761_v33 = vpop.f32.mrb[13].mxu1  ;;  %v3427_v15 = vsel %vm3414_vm3, %v6903_v8, -inf  ;;  %v6961_v57 = vpop.permute.xlu0 %1603 }
 0x2b0   :  { %3428 = vmax.xlane.f32.xlu1 %v3427_v15 }
 0x2b1   :  { %v3424_v5 = vsel %vm3414_vm3, %v6905_v10, -inf }
 0x2b2   :  { %v2710_v11 = vpop.f32.mrb[8].mxu0  ;;  %3425 = vmax.xlane.f32.xlu0 %v3424_v5  ;;  %v2634_v27 = vpop.f32.mrb[14].mxu1 }
 0x2b3   :  { %v6911_v52 = vmul.f32 0.25, %v2710_v11  ;;  %v5776_v58 = vpop.f32.mrb[9].mxu0  ;;  %v6913_v59 = vmul.f32 0.25, %v2634_v27  ;;  %v5771_v62 = vpop.f32.mrb[15].mxu1 }
 0x2b4   :  { %v6963_v33 = vpop.permute.xlu1 %1627 }
 0x2b5   :  { %v3430_v12 = vsel %vm3414_vm3, %v6913_v59, -inf  ;;  %v3433_v34 = vsel %vm3414_vm3, %v6911_v52, -inf }
 0x2b6   :  { %3431 = vmax.xlane.f32.xlu0 %v3430_v12  ;;  %3434 = vmax.xlane.f32.xlu1 %v3433_v34 }
 0x2b8   :  { %v6965_v5 = vpop.permute.xlu1 %1605 }
 0x2be   :  { %v2786_v28 = vpop.f32.mrb[16].mxu1 }
 0x2bf   :  { %v6919_v30 = vmul.f32 0.25, %v2786_v28  ;;  %v5781_v21 = vpop.f32.mrb[17].mxu1 }
 0x2c0   :  { %v2862_v31 = vpop.f32.mrb[10].mxu0 }
 0x2c1   :  { %v3436_v19 = vsel %vm3414_vm3, %v6919_v30, -inf  ;;  %v6923_v20 = vmul.f32 0.25, %v2862_v31  ;;  %v5786_v50 = vpop.f32.mrb[11].mxu0 }
 0x2c2   :  { %3437 = vmax.xlane.f32.xlu0 %v3436_v19  ;;  %v2938_v36 = vpop.f32.mrb[18].mxu1 }
 0x2c3   :  { %v6925_v32 = vmul.f32 0.25, %v2938_v36  ;;  %v5791_v37 = vpop.f32.mrb[19].mxu1  ;;  %v3439_v39 = vsel %vm3414_vm3, %v6923_v20, -inf }
 0x2c4   :  { %3440 = vmax.xlane.f32.xlu1 %v3439_v39  ;;  %v3014_v7 = vpop.f32.mrb[12].mxu0 }
 0x2c5   :  { %v3442_v9 = vsel %vm3414_vm3, %v6925_v32, -inf  ;;  %v6931_v1 = vmul.f32 0.25, %v3014_v7  ;;  %v5796_v24 = vpop.f32.mrb[13].mxu0 }
 0x2c6   :  { %3443 = vmax.xlane.f32.xlu0 %v3442_v9  ;;  %v3090_v43 = vpop.f32.mrb[20].mxu1 }
 0x2c7   :  { %v6933_v16 = vmul.f32 0.25, %v3090_v43  ;;  %v5801_v17 = vpop.f32.mrb[21].mxu1  ;;  %v3445_v23 = vsel %vm3414_vm3, %v6931_v1, -inf }
 0x2c8   :  { %3446 = vmax.xlane.f32.xlu1 %v3445_v23  ;;  %v3166_v2 = vpop.f32.mrb[14].mxu0 }
 0x2c9   :  { %v3448_v25 = vsel %vm3414_vm3, %v6933_v16, -inf  ;;  %v6939_v40 = vmul.f32 0.25, %v3166_v2  ;;  %v5806_v22 = vpop.f32.mrb[15].mxu0 }
 0x2ca   :  { %3449 = vmax.xlane.f32.xlu0 %v3448_v25  ;;  %v3242_v42 = vpop.f32.mrb[22].mxu1 }
 0x2cb   :  { %v6941_v51 = vmul.f32 0.25, %v3242_v42  ;;  %v5811_v35 = vpop.f32.mrb[23].mxu1  ;;  %v3451_v56 = vsel %vm3414_vm3, %v6939_v40, -inf }
 0x2cc   :  { %3452 = vmax.xlane.f32.xlu1 %v3451_v56  ;;  %v3318_v26 = vpop.f32.mrb[16].mxu0 }
 0x2cd   :  { %v3454_v18 = vsel %vm3414_vm3, %v6941_v51, -inf  ;;  %v6947_v54 = vmul.f32 0.25, %v3318_v26  ;;  %v5816_v47 = vpop.f32.mrb[17].mxu0 }
 0x2ce   :  { %3455 = vmax.xlane.f32.xlu0 %v3454_v18  ;;  %v3394_v55 = vpop.f32.mrb[24].mxu1 }
 0x2cf   :  { %v6949_v41 = vmul.f32 0.25, %v3394_v55  ;;  %v5821_v63 = vpop.f32.mrb[25].mxu1  ;;  %v3457_v3 = vsel %vm3414_vm3, %v6947_v54, -inf }
 0x2d0   :  { %3458 = vmax.xlane.f32.xlu1 %v3457_v3 }
 0x2d1   :  { %v3460_v4 = vsel %vm3414_vm3, %v6949_v41, -inf }
 0x2d2   :  { %3461 = vmax.xlane.f32.xlu0 %v3460_v4 }
 0x2e1   :  { %1629 = vrot.lane.b32.xlu1 %v6858_v29, %s6172_s4 }
 0x2e8   :  { %1617 = vrot.lane.b32.xlu0 %v6858_v29, %s6170_s1 }
 0x334   :  { %v3417_v15 = vpop.xlane.xlu0 %3416 }
 0x335   :  { %v3463_v11 = vsub.f32 %v6891_v13, %v3417_v15 }
 0x337   :  { %v3479_v27 = vmul.f32 1.442695, %v3463_v11 }
 0x338   :  { %v3423_v58 = vpop.xlane.xlu0 %3422 }
 0x339   :  { %5981 = vpow2.f32 %v3479_v27  ;;  %v3465_v62 = vsub.f32 %v6893_v48, %v3423_v58  ;;  %v3420_v12 = vpop.xlane.xlu1 %3419 }
 0x33a   :  { %v3464_v34 = vsub.f32 %v6897_v44, %v3420_v12 }
 0x33b   :  { %v3483_v28 = vmul.f32 1.442695, %v3465_v62 }
 0x33c   :  { %v3481_v21 = vmul.f32 1.442695, %v3464_v34 }
 0x33d   :  { %5983 = vpow2.f32 %v3483_v28  ;;  %v3429_v31 = vpop.xlane.xlu1 %3428 }
 0x33e   :  { %5985 = vpow2.f32 %v3481_v21  ;;  %v3467_v19 = vsub.f32 %v6903_v8, %v3429_v31 }
 0x33f   :  { %v3426_v50 = vpop.xlane.xlu0 %3425 }
 0x340   :  { %v3466_v36 = vsub.f32 %v6905_v10, %v3426_v50  ;;  %v3487_v37 = vmul.f32 1.442695, %v3467_v19 }
 0x342   :  { %v3485_v13 = vmul.f32 1.442695, %v3466_v36  ;;  %5987 = vpow2.f32 %v3487_v37 }
 0x343   :  { %v6972_v39 = vpop.eup %5981  ;;  %v3432_v7 = vpop.xlane.xlu0 %3431 }
 0x344   :  { %v3435_v48 = vpop.xlane.xlu1 %3434  ;;  %5989 = vpow2.f32 %v3485_v13  ;;  %v3468_v44 = vsub.f32 %v6913_v59, %v3432_v7  ;;  %v3511_v24 = vsel %vm3414_vm3, %v6972_v39, 0.0 }
 0x345   :  { %v3469_v9 = vsub.f32 %v6911_v52, %v3435_v48  ;;  %3512 = vadd.xlane.f32.xlu1 %v3511_v24 }
 0x346   :  { %v3489_v10 = vmul.f32 1.442695, %v3468_v44 }
 0x347   :  { %v3491_v8 = vmul.f32 1.442695, %v3469_v9  ;;  %v6978_v43 = vpop.eup %5983 }
 0x348   :  { %v6980_v17 = vpop.eup %5985  ;;  %v3517_v23 = vsel %vm3414_vm3, %v6978_v43, 0.0 }
 0x349   :  { %5991 = vpow2.f32 %v3491_v8  ;;  %3518 = vadd.xlane.f32.xlu1 %v3517_v23  ;;  %v3514_v59 = vsel %vm3414_vm3, %v6980_v17, 0.0 }
 0x34a   :  { %3515 = vadd.xlane.f32.xlu0 %v3514_v59  ;;  %5993 = vpow2.f32 %v3489_v10 }
 0x34c   :  { %v6986_v52 = vpop.eup %5987 }
 0x34d   :  { %v3523_v2 = vsel %vm3414_vm3, %v6986_v52, 0.0 }
 0x34e   :  { %v6990_v25 = vpop.eup %5989  ;;  %3524 = vadd.xlane.f32.xlu1 %v3523_v2 }
 0x34f   :  { %v3438_v22 = vpop.xlane.xlu0 %3437  ;;  %v3520_v42 = vsel %vm3414_vm3, %v6990_v25, 0.0 }
 0x350   :  { %v3470_v35 = vsub.f32 %v6919_v30, %v3438_v22  ;;  %3521 = vadd.xlane.f32.xlu0 %v3520_v42  ;;  %v6045_v42 = vld [vmem:[#allocation8] ss:$0 sm:$0xff] }
 0x351   :  { %v3441_v56 = vpop.xlane.xlu1 %3440 }
 0x352   :  { %v3493_v26 = vmul.f32 1.442695, %v3470_v35  ;;  %v3471_v18 = vsub.f32 %v6923_v20, %v3441_v56  ;;  %v7043_v35 = vadd.f32 %v6045_v42, %v6848_v61  ;;  %v1705_v61 = vcombine.low %v6439_v53, %v6959_v60 }
 0x353   :  { %v6996_v47 = vpop.eup %5991  ;;  %v3444_v55 = vpop.xlane.xlu0 %3443 }
 0x354   :  { %5995 = vpow2.f32 %v3493_v26  ;;  %v3472_v63 = vsub.f32 %v6925_v32, %v3444_v55  ;;  %v3495_v3 = vmul.f32 1.442695, %v3471_v18  ;;  %v3529_v4 = vsel %vm3414_vm3, %v6996_v47, 0.0  ;;  %v7001_v15 = vpop.eup %5993 }
 0x355   :  { %v3447_v11 = vpop.xlane.xlu1 %3446  ;;  %3530 = vadd.xlane.f32.xlu0 %v3529_v4  ;;  %v3526_v32 = vsel %vm3414_vm3, %v7001_v15, 0.0  ;;  %v1722_v4 = vcombine.high %v6961_v57, %v6963_v33 }
 0x356   :  { %v3497_v30 = vmul.f32 1.442695, %v3472_v63  ;;  %5997 = vpow2.f32 %v3495_v3  ;;  %v3473_v27 = vsub.f32 %v6931_v1, %v3447_v11  ;;  %v1706_v3 = vcombine.high %v6439_v53, %v6959_v60 }
 0x357   :  { %v3450_v58 = vpop.xlane.xlu0 %3449  ;;  %v1713_v11 = vrot.slane %v1705_v61, %v6449_v0 }
 0x358   :  { %5999 = vpow2.f32 %v3497_v30  ;;  %v3474_v20 = vsub.f32 %v6933_v16, %v3450_v58  ;;  %v3499_v62 = vmul.f32 1.442695, %v3473_v27  ;;  %v1720_v30 = vrot.slane %v1706_v3, %v6449_v0 }
 0x359   :  { %v3453_v12 = vpop.xlane.xlu1 %3452  ;;  %3527 = vadd.xlane.f32.xlu0 %v3526_v32  ;;  %v1736_v58 = vrot.slane %v1722_v4, %v6449_v0 }
 0x35a   :  { %v3501_v34 = vmul.f32 1.442695, %v3474_v20  ;;  %6001 = vpow2.f32 %v3499_v62  ;;  %v3475_v28 = vsub.f32 %v6939_v40, %v3453_v12 }
 0x35b   :  { %v3456_v21 = vpop.xlane.xlu0 %3455  ;;  %v1753_v32 = vcombine.low %v1720_v30, %v1736_v58  ;;  %v1754_v12 = vcombine.high %v1720_v30, %v1736_v58 }
 0x35c   :  { %6003 = vpow2.f32 %v3501_v34  ;;  %v3476_v31 = vsub.f32 %v6941_v51, %v3456_v21  ;;  %v3503_v19 = vmul.f32 1.442695, %v3475_v28 }
 0x35d   :  { %v3459_v1 = vpop.xlane.xlu1 %3458 }
 0x35e   :  { %v7009_v50 = vpop.eup %5995  ;;  %6005 = vpow2.f32 %v3503_v19  ;;  %v3477_v16 = vsub.f32 %v6947_v54, %v3459_v1  ;;  %v3505_v13 = vmul.f32 1.442695, %v3476_v31 }
 0x35f   :  { %v3532_v36 = vsel %vm3414_vm3, %v7009_v50, 0.0  ;;  %v3462_v56 = vpop.xlane.xlu0 %3461 }
 0x360   :  { %v7014_v37 = vpop.eup %5997  ;;  %3533 = vadd.xlane.f32.xlu1 %v3532_v36  ;;  %v3507_v7 = vmul.f32 1.442695, %v3477_v16  ;;  %v3478_v26 = vsub.f32 %v6949_v41, %v3462_v56  ;;  %v1721_v41 = vcombine.low %v6961_v57, %v6963_v33  ;;  %v1761_v57 = vrot.slane %v1753_v32, %v6453_v6 }
 0x361   :  { %v3535_v40 = vsel %vm3414_vm3, %v7014_v37, 0.0  ;;  %v1630_v53 = vpop.permute.xlu1 %1629  ;;  %v1768_v33 = vrot.slane %v1754_v12, %v6453_v6 }
 0x362   :  { %v7018_v48 = vpop.eup %5999  ;;  %6007 = vpow2.f32 %v3507_v7  ;;  %3536 = vadd.xlane.f32.xlu0 %v3535_v40  ;;  %v3509_v18 = vmul.f32 1.442695, %v3478_v26  ;;  %v1729_v27 = vrot.slane %v1721_v41, %v6449_v0  ;;  %v1789_v31 = vcombine.low %v6965_v5, %v1630_v53 }
 0x363   :  { %v3538_v51 = vsel %vm3414_vm3, %v7018_v48, 0.0  ;;  %6009 = vpow2.f32 %v3505_v13  ;;  %v1618_v34 = vpop.permute.xlu0 %1617  ;;  %v1790_v1 = vcombine.high %v6965_v5, %v1630_v53  ;;  %v1993_v13 = vcombine.low %v1761_v57, %v1768_v33 }
 0x364   :  { %v7022_v44 = vpop.eup %6001  ;;  %3539 = vadd.xlane.f32.xlu1 %v3538_v51  ;;  %6011 = vpow2.f32 %v3509_v18  ;;  %v1737_v20 = vcombine.low %v1713_v11, %v1729_v27  ;;  %v1738_v62 = vcombine.high %v1713_v11, %v1729_v27  ;;  %v1773_v21 = vcombine.low %v6858_v29, %v1618_v34 }
 0x365   :  { %v3541_v54 = vsel %vm3414_vm3, %v7022_v44, 0.0  ;;  %v1774_v19 = vcombine.high %v6858_v29, %v1618_v34  ;;  %v5534_v7 = vcombine.high %v1761_v57, %v1768_v33  ;;  %v1797_v51 = vrot.slane %v1789_v31, %v6449_v0 }
 0x366   :  { %v7026_v9 = vpop.eup %6003  ;;  %3542 = vadd.xlane.f32.xlu0 %v3541_v54  ;;  %v1745_v60 = vrot.slane %v1737_v20, %v6453_v6  ;;  %v1752_v28 = vrot.slane %v1738_v62, %v6453_v6  ;;  %v1781_v40 = vrot.slane %v1773_v21, %v6449_v0  ;;  %v2000_v5 = vrot.slane %v1993_v13, %v6449_v0 }
 0x367   :  { %v3544_v8 = vsel %vm3414_vm3, %v7026_v9, 0.0 }
 0x368   :  { %v7028_v24 = vpop.eup %6005  ;;  %v1977_v16 = vcombine.low %v1745_v60, %v1752_v28  ;;  %v5533_v36 = vcombine.high %v1745_v60, %v1752_v28  ;;  %v1805_v42 = vcombine.low %v1781_v40, %v1797_v51  ;;  %v1806_v56 = vcombine.high %v1781_v40, %v1797_v51 }
 0x369   :  { %v3547_v10 = vsel %vm3414_vm3, %v7028_v24, 0.0 }
 0x36a   :  { %3545 = vadd.xlane.f32.xlu0 %v3544_v8  ;;  %3548 = vadd.xlane.f32.xlu1 %v3547_v10  ;;  %v1788_v8 = vrot.slane %v1774_v19, %v6449_v0  ;;  %v1804_v10 = vrot.slane %v1790_v1, %v6449_v0  ;;  %v1992_v29 = vrot.slane %v5533_v36, %v6449_v0 }
 0x36b   :  { %v1813_v4 = vrot.slane %v1805_v42, %v6453_v6  ;;  %v1820_v11 = vrot.slane %v1806_v56, %v6453_v6 }
 0x36c   :  { %v7034_v23 = vpop.eup %6007  ;;  %v1821_v18 = vcombine.low %v1788_v8, %v1804_v10 }
 0x36d   :  { %v3553_v59 = vsel %vm3414_vm3, %v7034_v23, 0.0  ;;  %v7038_v2 = vpop.eup %6009  ;;  %v2045_v34 = vcombine.low %v1813_v4, %v1820_v11  ;;  %v5535_v53 = vcombine.high %v1813_v4, %v1820_v11 }
 0x36e   :  { %3554 = vadd.xlane.f32.xlu0 %v3553_v59  ;;  %v3550_v22 = vsel %vm3414_vm3, %v7038_v2, 0.0  ;;  %v7050_v55 = vpop.eup %6011  ;;  %v1984_v59 = vrot.slane %v1977_v16, %v6449_v0  ;;  %v1829_v30 = vrot.slane %v1821_v18, %v6453_v6 }
 0x36f   :  { %v3556_v63 = vsel %vm3414_vm3, %v7050_v55, 0.0  ;;  %v7098_v1 = vrot.slane %v2045_v34, %v6449_v0 }
 0x370   :  { %v2009_v3 = vcombine.low %v1984_v59, %v1992_v29  ;;  %v2010_v33 = vcombine.high %v1984_v59, %v1992_v29 }
 0x372   :  { %3551 = vadd.xlane.f32.xlu0 %v3550_v22  ;;  %v2008_v22 = vrot.slane %v5534_v7, %v6449_v0  ;;  %v2017_v32 = vrot.slane %v2009_v3, %v6453_v6  ;;  %v2024_v51 = vrot.slane %v2010_v33, %v6453_v6 }
 0x374   :  { %v2025_v41 = vcombine.low %v2000_v5, %v2008_v22  ;;  %v2026_v21 = vcombine.high %v2000_v5, %v2008_v22 }
 0x376   :  { %v2033_v12 = vrot.slane %v2025_v41, %v6453_v6 }
 0x378   :  { %v2041_v13 = vcombine.low %v2017_v32, %v2033_v12 }
 0x37b   :  { %1619 = vrot.lane.b32.xlu1 %v7043_v35, %s6170_s1  ;;  %s5486_s1 = sshll.u32 %s6180_s27, 4  ;;  %s5487_s1 = int_to_ptr.vmem [resolvable:$true] %s5486_s1 }
 0x37c   :  { %p6139_p5 = scmp.lt.s32.totalorder %s5487_s1, %s5487_s1 }
 0x388   :  { %1607 = vrot.lane.b32.xlu0 %v7043_v35, %s6171_s15 }
 0x39f   :  { %3557 = vadd.xlane.f32.xlu1 %v3556_v63  ;;  %v1822_v63 = vcombine.high %v1788_v8, %v1804_v10 }
 0x3a1   :  { %v1836_v27 = vrot.slane %v1822_v63, %v6453_v6 }
 0x3a3   :  { %v2061_v28 = vcombine.low %v1829_v30, %v1836_v27  ;;  %v5536_v57 = vcombine.high %v1829_v30, %v1836_v27 }
 0x3a5   :  { %v7106_v7 = vrot.slane %v2061_v28, %v6449_v0 }
 0x3b0   :  { %1631 = vrot.lane.b32.xlu1 %v7043_v35, %s6172_s4 }
 0x3d2   :  { %v3513_v54 = vpop.xlane.xlu1 %3512 }
 0x3d3   :  { %6013 = vrcp.f32 %v3513_v54  ;;  %v2040_v54 = vrot.slane %v2026_v21, %v6453_v6 }
 0x3d5   :  { %v2043_v46 = vcombine.low %v2024_v51, %v2040_v54  ;;  %v2044_v41 = vcombine.high %v2024_v51, %v2040_v54 }
 0x3d6   :  { %v3519_v26 = vpop.xlane.xlu1 %3518 }
 0x3d7   :  { %v3516_v61 = vpop.xlane.xlu0 %3515  ;;  %6015 = vrcp.f32 %v3519_v26 }
 0x3d8   :  { %6017 = vrcp.f32 %v3516_v61 }
 0x3db   :  { %v3525_v58 = vpop.xlane.xlu1 %3524 }
 0x3dc   :  { %6019 = vrcp.f32 %v3525_v58 }
 0x3dd   :  { %v6014_v20 = vpop.eup %6013  ;;  %v3522_v62 = vpop.xlane.xlu0 %3521 }
 0x3de   :  { %v3560_v60 = vmul.f32 %v6014_v20, %v6972_v39  ;;  %6021 = vrcp.f32 %v3522_v62  ;;  %v7101_v39 = vrot.slane %v5535_v53, %v6449_v0 }
 0x3e0   :  { %5825 = vmatmul.mubr.msk.f32.vlgmr.msra.gmra.mrb[18].mxu0 %vm3414_vm3, %v3560_v60  ;;  %v2077_v10 = vcombine.low %v7098_v1, %v7101_v39 }
 0x3e1   :  { %v6016_v31 = vpop.eup %6015  ;;  %5833 = vmatpush3.msra.mxu0 %v1975_v49  ;;  %5834 = vmatprep.mubr.msk.f32.mxu0 %vm6174_vm1, %v6173_v45  ;;  %v2076_v49 = vrot.slane %v5536_v57, %v6449_v0 }
 0x3e2   :  { %v6018_v19 = vpop.eup %6017  ;;  %v3564_v16 = vmul.f32 %v6016_v31, %v6978_v43  ;;  %v3531_v36 = vpop.xlane.xlu0 %3530  ;;  %5842 = vmatprep.subr.mxu0 %v6173_v45 }
 0x3e3   :  { %v3562_v40 = vmul.f32 %v6018_v19, %v6980_v17  ;;  %6023 = vrcp.f32 %v3531_v36  ;;  %v2093_v59 = vcombine.low %v7106_v7, %v2076_v49  ;;  %v2094_v4 = vcombine.high %v7106_v7, %v2076_v49 }
 0x3e4   :  { %5835 = vmatmul.mubr.msk.f32.vlgmr.msra.gmra.mrb[20].mxu0 %vm3414_vm3, %v3564_v16 }
 0x3e5   :  { %5830 = vmatmul.mubr.msk.f32.vlgmr.msra.gmra.mrb[26].mxu1 %vm3414_vm3, %v3562_v40  ;;  %5843 = vmatpush3.msra.mxu0 %v2041_v13  ;;  %v2101_v5 = vrot.slane %v2093_v59, %v6453_v6  ;;  %v2108_v27 = vrot.slane %v2094_v4, %v6453_v6 }
 0x3e6   :  { %v6020_v43 = vpop.eup %6019  ;;  %v3528_v8 = vpop.xlane.xlu0 %3527  ;;  %5838 = vmatpush3.msra.mxu1 %v1976_v14  ;;  %5839 = vmatprep.mubr.msk.f32.mxu1 %vm6174_vm1, %v6173_v45  ;;  %v2042_v14 = vcombine.high %v2017_v32, %v2033_v12 }
 0x3e7   :  { %v3568_v17 = vmul.f32 %v6020_v43, %v6986_v52  ;;  %6025 = vrcp.f32 %v3528_v8  ;;  %5844 = vmatprep.mubr.msk.f32.mxu0 %vm6174_vm1, %v6173_v45  ;;  %5847 = vmatprep.subr.mxu1 %v6173_v45  ;;  %v2085_v52 = vrot.slane %v2077_v10, %v6453_v6 }
 0x3e8   :  { %v6022_v29 = vpop.eup %6021  ;;  %5852 = vmatprep.subr.mxu0 %v6173_v45 }
 0x3e9   :  { %v3566_v38 = vmul.f32 %v6022_v29, %v6990_v25  ;;  %5845 = vmatmul.mubr.msk.f32.vlgmr.msra.gmra.mrb[22].mxu0 %vm3414_vm3, %v3568_v17  ;;  %v2109_v26 = vcombine.low %v2085_v52, %v2101_v5  ;;  %v2110_v62 = vcombine.high %v2085_v52, %v2101_v5 }
 0x3ea   :  { %5853 = vmatpush3.msra.mxu0 %v2043_v46  ;;  %5854 = vmatprep.mubr.msk.f32.mxu0 %vm6174_vm1, %v6173_v45 }
 0x3eb   :  { %5840 = vmatmul.mubr.msk.f32.vlgmr.msra.gmra.mrb[28].mxu1 %vm3414_vm3, %v3566_v38  ;;  %5862 = vmatprep.subr.mxu0 %v6173_v45 }
 0x3ec   :  { %5848 = vmatpush3.msra.mxu1 %v2042_v14  ;;  %5849 = vmatprep.mubr.msk.f32.mxu1 %vm6174_vm1, %v6173_v45 }
 0x3ed   :  { %v6024_v25 = vpop.eup %6023  ;;  %v3534_v22 = vpop.xlane.xlu1 %3533  ;;  %5857 = vmatprep.subr.mxu1 %v6173_v45 }
 0x3ee   :  { %v3572_v42 = vmul.f32 %v6024_v25, %v6996_v47  ;;  %6027 = vrcp.f32 %v3534_v22  ;;  %v2078_v47 = vcombine.high %v7098_v1, %v7101_v39 }
 0x3ef   :  { %v3537_v56 = vpop.xlane.xlu0 %3536 }
 0x3f0   :  { %6029 = vrcp.f32 %v3537_v56  ;;  %5855 = vmatmul.mubr.msk.f32.vlgmr.msra.gmra.mrb[24].mxu0 %vm3414_vm3, %v3572_v42  ;;  %v2092_v30 = vrot.slane %v2078_v47, %v6453_v6 }
 0x3f1   :  { %v6026_v18 = vpop.eup %6025  ;;  %v3540_v63 = vpop.xlane.xlu1 %3539  ;;  %5863 = vmatpush3.msra.mxu0 %v2109_v26  ;;  %5864 = vmatprep.mubr.msk.f32.mxu0 %vm6174_vm1, %v6173_v45 }
 0x3f2   :  { %v3570_v61 = vmul.f32 %v6026_v18, %v7001_v15  ;;  %6031 = vrcp.f32 %v3540_v63  ;;  %5872 = vmatprep.subr.mxu0 %v6173_v45  ;;  %v2111_v34 = vcombine.low %v2092_v30, %v2108_v27 }
 0x3f3   :  { %v3543_v3 = vpop.xlane.xlu0 %3542 }
 0x3f4   :  { %6033 = vrcp.f32 %v3543_v3  ;;  %5850 = vmatmul.mubr.msk.f32.vlgmr.msra.gmra.mrb[30].mxu1 %vm3414_vm3, %v3570_v61 }
 0x3f5   :  { %5858 = vmatpush3.msra.mxu1 %v2044_v41  ;;  %5859 = vmatprep.mubr.msk.f32.mxu1 %vm6174_vm1, %v6173_v45 }
 0x3f6   :  { %5867 = vmatprep.subr.mxu1 %v6173_v45 }
 0x3f7   :  { %v3546_v15 = vpop.xlane.xlu0 %3545 }
 0x3f8   :  { %v6028_v11 = vpop.eup %6027  ;;  %6035 = vrcp.f32 %v3546_v15 }
 0x3f9   :  { %v3574_v58 = vmul.f32 %v6028_v11, %v7009_v50  ;;  %v2112_v50 = vcombine.high %v2092_v30, %v2108_v27 }
 0x3fa   :  { %v6030_v20 = vpop.eup %6029 }
 0x3fb   :  { %v3576_v32 = vmul.f32 %v6030_v20, %v7014_v37  ;;  %5860 = vmatmul.mubr.msk.f32.vlgmr.msra.gmra.mrb[32].mxu1 %vm3414_vm3, %v3574_v58  ;;  %v3555_v57 = vpop.xlane.xlu0 %3554 }
 0x3fc   :  { %v6032_v12 = vpop.eup %6031  ;;  %5868 = vmatpush3.msra.mxu1 %v2110_v62  ;;  %5869 = vmatprep.mubr.msk.f32.mxu1 %vm6174_vm1, %v6173_v45 }
 0x3fd   :  { %v3578_v53 = vmul.f32 %v6032_v12, %v7018_v48  ;;  %5865 = vmatmul.mubr.msk.f32.vlgmr.msra.gmra.mrb[26].mxu0 %vm3414_vm3, %v3576_v32  ;;  %5877 = vmatprep.subr.mxu1 %v6173_v45 }
 0x3fe   :  { %v6034_v60 = vpop.eup %6033  ;;  %5873 = vmatpush3.msra.mxu0 %v2111_v34  ;;  %5874 = vmatprep.mubr.msk.f32.mxu0 %vm6174_vm1, %v6173_v45 }
 0x3ff   :  { %v3580_v37 = vmul.f32 %v6034_v60, %v7022_v44  ;;  %5870 = vmatmul.mubr.msk.f32.vlgmr.msra.gmra.mrb[34].mxu1 %vm3414_vm3, %v3578_v53  ;;  %5882 = vmatprep.subr.mxu0 %v6173_v45  ;;  %v3549_v44 = vpop.xlane.xlu1 %3548  ;;  %v3552_v21 = vpop.xlane.xlu0 %3551 }
 0x400   :  { %5878 = vmatpush3.msra.mxu1 %v2112_v50  ;;  %5879 = vmatprep.mubr.msk.f32.mxu1 %vm6174_vm1, %v6173_v45  ;;  %6037 = vrcp.f32 %v3549_v44 }
 0x401   :  { %5875 = vmatmul.mubr.msk.f32.vlgmr.msra.gmra.mrb[28].mxu0 %vm3414_vm3, %v3580_v37  ;;  %5887 = vmatprep.subr.mxu1 %v6173_v45  ;;  %6039 = vrcp.f32 %v3552_v21 }
 0x402   :  { %v6036_v48 = vpop.eup %6035  ;;  %5884 = vmatprep.mubr.msk.f32.mxu0 %vm6174_vm1, %v6173_v45  ;;  %6041 = vrcp.f32 %v3555_v57 }
 0x403   :  { %v3582_v28 = vmul.f32 %v6036_v48, %v7026_v9  ;;  %v1620_v33 = vpop.permute.xlu1 %1619  ;;  %v1608_v39 = vpop.permute.xlu0 %1607 }
 0x404   :  { %v1841_v19 = vcombine.low %v7043_v35, %v1620_v33  ;;  %v1842_v1 = vcombine.high %v7043_v35, %v1620_v33 }
 0x405   :  { %5880 = vmatmul.mubr.msk.f32.vlgmr.msra.gmra.mrb[36].mxu1 %vm3414_vm3, %v3582_v28 }
 0x406   :  { %5889 = vmatprep.mubr.msk.f32.mxu1 %vm6174_vm1, %v6173_v45  ;;  %v1849_v9 = vrot.slane %v1841_v19, %v6449_v0  ;;  %v1856_v7 = vrot.slane %v1842_v1, %v6449_v0 }
 0x40a   :  { %v6038_v42 = vpop.eup %6037 }
 0x40b   :  { %v6040_v61 = vpop.eup %6039  ;;  %v3584_v58 = vmul.f32 %v6038_v42, %v7028_v24 }
 0x40c   :  { %v6042_v47 = vpop.eup %6041  ;;  %v3586_v20 = vmul.f32 %v6040_v61, %v7038_v2  ;;  %v5366_v61 = vld [vmem:[%s7388_s9 + $0x10] sm:$0xff] }
 0x40d   :  { %v3588_v12 = vmul.f32 %v6042_v47, %v7034_v23 }
 0x42c   :  { %v3558_v31 = vpop.xlane.xlu1 %3557 }
 0x42d   :  { %6043 = vrcp.f32 %v3558_v31 }
 0x430   :  { %v1632_v16 = vpop.permute.xlu1 %1631 }
 0x431   :  { %v1857_v36 = vcombine.low %v1608_v39, %v1632_v16  ;;  %v1858_v13 = vcombine.high %v1608_v39, %v1632_v16 }
 0x433   :  { %v1865_v49 = vrot.slane %v1857_v36, %v6449_v0  ;;  %v1872_v40 = vrot.slane %v1858_v13, %v6449_v0 }
 0x435   :  { %v1873_v51 = vcombine.low %v1849_v9, %v1865_v49  ;;  %v1874_v54 = vcombine.high %v1849_v9, %v1865_v49  ;;  %v1889_v43 = vcombine.low %v1856_v7, %v1872_v40  ;;  %v1890_v8 = vcombine.high %v1856_v7, %v1872_v40 }
 0x437   :  { %v1881_v35 = vrot.slane %v1873_v51, %v6453_v6  ;;  %v1888_v17 = vrot.slane %v1874_v54, %v6453_v6  ;;  %v1897_v10 = vrot.slane %v1889_v43, %v6453_v6  ;;  %v1904_v59 = vrot.slane %v1890_v8, %v6453_v6  ;;  %v6044_v27 = vpop.eup %6043 }
 0x438   :  { %v3590_v34 = vmul.f32 %v6044_v27, %v7050_v55 }
 0x439   :  { %v2113_v29 = vcombine.low %v1881_v35, %v1888_v17  ;;  %v5537_v46 = vcombine.high %v1881_v35, %v1888_v17  ;;  %v2129_v38 = vcombine.low %v1897_v10, %v1904_v59  ;;  %v5538_v14 = vcombine.high %v1897_v10, %v1904_v59 }
 0x43b   :  { %v2120_v52 = vrot.slane %v2113_v29, %v6449_v0  ;;  %v2128_v5 = vrot.slane %v5537_v46, %v6449_v0  ;;  %v2136_v25 = vrot.slane %v2129_v38, %v6449_v0  ;;  %v2144_v22 = vrot.slane %v5538_v14, %v6449_v0  ;;  %v5364_v38 = vld [vmem:[%s7388_s9] sm:$0xff]  ;;  %v5365_v14 = vld [vmem:[%s7388_s9 + $0x8] sm:$0xff] }
 0x43c   :  { %v5948_v42 = vpack.c.bf16 %v5365_v14, %v5364_v38 }
 0x43d   :  { %v2145_v56 = vcombine.low %v2120_v52, %v2128_v5  ;;  %v2161_v26 = vcombine.low %v2136_v25, %v2144_v22  ;;  %v2146_v18 = vcombine.high %v2120_v52, %v2128_v5  ;;  %v2162_v63 = vcombine.high %v2136_v25, %v2144_v22 }
 0x43f   :  { %v2153_v3 = vrot.slane %v2145_v56, %v6453_v6  ;;  %v2169_v41 = vrot.slane %v2161_v26, %v6453_v6  ;;  %v2160_v4 = vrot.slane %v2146_v18, %v6453_v6  ;;  %v2176_v15 = vrot.slane %v2162_v63, %v6453_v6 }
 0x441   :  { %v2177_v11 = vcombine.low %v2153_v3, %v2169_v41  ;;  %v2178_v30 = vcombine.high %v2153_v3, %v2169_v41  ;;  %v2179_v62 = vcombine.low %v2160_v4, %v2176_v15  ;;  %v2180_v32 = vcombine.high %v2160_v4, %v2176_v15  ;;  %v5367_v3 = vld [vmem:[%s7388_s9 + $0x18] sm:$0xff] }
 0x443   :  { %5883 = vmatpush3.msra.mxu0 %v2177_v11  ;;  %5888 = vmatpush3.msra.mxu1 %v2178_v30  ;;  %v5952_v30 = vpack.c.bf16 %v5367_v3, %v5366_v61 }
 0x444   :  { %5885 = vmatmul.mubr.msk.f32.vlgmr.msra.gmra.mrb[30].mxu0 %vm3414_vm3, %v3584_v58  ;;  %5890 = vmatmul.mubr.msk.f32.vlgmr.msra.gmra.mrb[38].mxu1 %vm3414_vm3, %v3586_v20 }
 0x445   :  { %5892 = vmatprep.subr.mxu0 %v6173_v45  ;;  %5897 = vmatprep.subr.mxu1 %v6173_v45 }
 0x446   :  { %5893 = vmatpush3.msra.mxu0 %v2179_v62  ;;  %5898 = vmatpush3.msra.mxu1 %v2180_v32 }
 0x447   :  { %5894 = vmatprep.mubr.msk.f32.mxu0 %vm6174_vm1, %v6173_v45  ;;  %5899 = vmatprep.mubr.msk.f32.mxu1 %vm6174_vm1, %v6173_v45 }
 0x448   :  { %5895 = vmatmul.mubr.msk.f32.vlgmr.msra.gmra.mrb[32].mxu0 %vm3414_vm3, %v3588_v12  ;;  %5900 = vmatmul.mubr.msk.f32.vlgmr.msra.gmra.mrb[40].mxu1 %vm3414_vm3, %v3590_v34 }
 0x449   :  { %5949 = vmatprep.subr.bf16.mxu0 %v5948_v42 }
 0x44a   :  { %5951 = vmatpush3.bf16.msra.mxu0 %v5948_v42 }
 0x44b   :  { %5953 = vmatprep.subr.bf16.mxu0 %v5952_v30 }
 0x44e   :  { %5955 = vmatpush3.bf16.msra.mxu0 %v5952_v30 }
 0x4b3   :  { %v3660_v24 = vpop.f32.mrb[18].mxu0 }
 0x4b4   :  { %v5826_v2 = vpop.f32.mrb[19].mxu0 }
 0x4b7   :  { %v3806_v53 = vpop.f32.mrb[20].mxu0 }
 0x4b8   :  { %v3733_v60 = vpop.f32.mrb[26].mxu1  ;;  %v4759_v50 = vcombine.low %v3660_v24, %v3806_v53  ;;  %v4760_v23 = vcombine.high %v3660_v24, %v3806_v53  ;;  %v5836_v37 = vpop.f32.mrb[21].mxu0 }
 0x4b9   :  { %v5831_v55 = vpop.f32.mrb[27].mxu1 }
 0x4ba   :  { %v4767_v45 = vrot.slane %v4759_v50, %v6449_v0  ;;  %v4774_v31 = vrot.slane %v4760_v23, %v6449_v0 }
 0x4bc   :  { %v3952_v48 = vpop.f32.mrb[22].mxu0 }
 0x4bd   :  { %v5846_v28 = vpop.f32.mrb[23].mxu0 }
 0x4be   :  { %v3879_v44 = vpop.f32.mrb[28].mxu1 }
 0x4bf   :  { %v4775_v57 = vcombine.low %v3733_v60, %v3879_v44  ;;  %v4776_v33 = vcombine.high %v3733_v60, %v3879_v44  ;;  %v5841_v21 = vpop.f32.mrb[29].mxu1 }
 0x4c1   :  { %v4783_v19 = vrot.slane %v4775_v57, %v6449_v0  ;;  %v4790_v1 = vrot.slane %v4776_v33, %v6449_v0 }
 0x4c3   :  { %v4791_v39 = vcombine.low %v4767_v45, %v4783_v19  ;;  %v4792_v16 = vcombine.high %v4767_v45, %v4783_v19  ;;  %v4807_v36 = vcombine.low %v4774_v31, %v4790_v1  ;;  %v4808_v13 = vcombine.high %v4774_v31, %v4790_v1  ;;  %v4098_v9 = vpop.f32.mrb[24].mxu0 }
 0x4c4   :  { %v4827_v7 = vcombine.low %v3952_v48, %v4098_v9  ;;  %v4828_v49 = vcombine.high %v3952_v48, %v4098_v9  ;;  %v5856_v40 = vpop.f32.mrb[25].mxu0 }
 0x4c5   :  { %v4799_v51 = vrot.slane %v4791_v39, %v6453_v6  ;;  %v4806_v54 = vrot.slane %v4792_v16, %v6453_v6  ;;  %v4815_v43 = vrot.slane %v4807_v36, %v6453_v6  ;;  %v4822_v8 = vrot.slane %v4808_v13, %v6453_v6  ;;  %v5368_v39 = vld [vmem:[%s7388_s9 + $0x20] sm:$0xff]  ;;  %v5369_v16 = vld [vmem:[%s7388_s9 + $0x28] sm:$0xff] }
 0x4c6   :  { %v4835_v12 = vrot.slane %v4827_v7, %v6449_v0  ;;  %v4842_v53 = vrot.slane %v4828_v49, %v6449_v0  ;;  %v5956_v9 = vpack.c.bf16 %v5369_v16, %v5368_v39 }
 0x4c7   :  { %v5031_v35 = vcombine.low %v4799_v51, %v4806_v54  ;;  %v5587_v17 = vcombine.high %v4799_v51, %v4806_v54  ;;  %v5047_v10 = vcombine.low %v4815_v43, %v4822_v8  ;;  %v5588_v59 = vcombine.high %v4815_v43, %v4822_v8  ;;  %v4025_v29 = vpop.f32.mrb[30].mxu1 }
 0x4c8   :  { %v5851_v46 = vpop.f32.mrb[31].mxu1  ;;  %5957 = vmatprep.subr.bf16.mxu0 %v5956_v9 }
 0x4c9   :  { %v5038_v52 = vrot.slane %v5031_v35, %v6449_v0  ;;  %v5046_v5 = vrot.slane %v5587_v17, %v6449_v0  ;;  %v5054_v25 = vrot.slane %v5047_v10, %v6449_v0  ;;  %v5062_v22 = vrot.slane %v5588_v59, %v6449_v0  ;;  %v5371_v46 = vld [vmem:[%s7388_s9 + $0x38] sm:$0xff]  ;;  %5959 = vmatpush3.bf16.msra.mxu0 %v5956_v9 }
 0x4cb   :  { %v5063_v56 = vcombine.low %v5038_v52, %v5046_v5  ;;  %v5079_v26 = vcombine.low %v5054_v25, %v5062_v22  ;;  %v5064_v18 = vcombine.high %v5038_v52, %v5046_v5  ;;  %v5080_v63 = vcombine.high %v5054_v25, %v5062_v22 }
 0x4cd   :  { %v7233_v41 = vrot.slane %v5063_v56, %v6453_v6  ;;  %v7236_v47 = vrot.slane %v5079_v26, %v6453_v6  ;;  %v5078_v4 = vrot.slane %v5064_v18, %v6453_v6  ;;  %v5094_v15 = vrot.slane %v5080_v63, %v6453_v6 }
 0x4ce   :  { %v4171_v11 = vpop.f32.mrb[32].mxu1 }
 0x4cf   :  { %v4843_v27 = vcombine.low %v4025_v29, %v4171_v11  ;;  %v4844_v58 = vcombine.high %v4025_v29, %v4171_v11  ;;  %v5861_v20 = vpop.f32.mrb[33].mxu1  ;;  %v5096_v62 = vcombine.high %v7233_v41, %v7236_v47  ;;  %v5097_v32 = vcombine.low %v5078_v4, %v5094_v15  ;;  %v5370_v29 = vld [vmem:[%s7388_s9 + $0x30] sm:$0xff] }
 0x4d0   :  { %v4244_v34 = vpop.f32.mrb[26].mxu0  ;;  %v5098_v24 = vcombine.high %v5078_v4, %v5094_v15  ;;  %v5095_v2 = vcombine.low %v7233_v41, %v7236_v47  ;;  %v5960_v5 = vpack.c.bf16 %v5371_v46, %v5370_v29 }
 0x4d1   :  { %v4851_v60 = vrot.slane %v4843_v27, %v6449_v0  ;;  %v4858_v50 = vrot.slane %v4844_v58, %v6449_v0  ;;  %v5866_v23 = vpop.f32.mrb[27].mxu0  ;;  %5307 = vrot.lane.b32.xlu0 %v5096_v62, %s6177_s5 }
 0x4d2   :  { %v4317_v37 = vpop.f32.mrb[34].mxu1  ;;  %5961 = vmatprep.subr.bf16.mxu0 %v5960_v5 }
 0x4d3   :  { %v4859_v55 = vcombine.low %v4835_v12, %v4851_v60  ;;  %v4860_v48 = vcombine.high %v4835_v12, %v4851_v60  ;;  %v4875_v28 = vcombine.low %v4842_v53, %v4858_v50  ;;  %v4876_v44 = vcombine.high %v4842_v53, %v4858_v50  ;;  %v5871_v57 = vpop.f32.mrb[35].mxu1  ;;  %5963 = vmatpush3.bf16.msra.mxu0 %v5960_v5 }
 0x4d4   :  { %v4390_v33 = vpop.f32.mrb[28].mxu0 }
 0x4d5   :  { %v4867_v21 = vrot.slane %v4859_v55, %v6453_v6  ;;  %v4874_v45 = vrot.slane %v4860_v48, %v6453_v6  ;;  %v4883_v31 = vrot.slane %v4875_v28, %v6453_v6  ;;  %v4890_v19 = vrot.slane %v4876_v44, %v6453_v6  ;;  %v5876_v1 = vpop.f32.mrb[29].mxu0  ;;  %5323 = vrot.lane.b32.xlu0 %v5097_v32, %s6178_s18 }
 0x4d6   :  { %v4895_v36 = vcombine.low %v4244_v34, %v4390_v33  ;;  %v4896_v13 = vcombine.high %v4244_v34, %v4390_v33 }
 0x4d7   :  { %v5099_v7 = vcombine.low %v4867_v21, %v4874_v45  ;;  %v5589_v49 = vcombine.high %v4867_v21, %v4874_v45  ;;  %v5115_v40 = vcombine.low %v4883_v31, %v4890_v19  ;;  %v5590_v51 = vcombine.high %v4883_v31, %v4890_v19 }
 0x4d8   :  { %v4903_v54 = vrot.slane %v4895_v36, %v6449_v0  ;;  %v4463_v43 = vpop.f32.mrb[36].mxu1  ;;  %v4910_v38 = vrot.slane %v4896_v13, %v6449_v0 }
 0x4d9   :  { %v4911_v8 = vcombine.low %v4317_v37, %v4463_v43  ;;  %v4912_v35 = vcombine.high %v4317_v37, %v4463_v43  ;;  %v5881_v17 = vpop.f32.mrb[37].mxu1  ;;  %5339 = vrot.lane.b32.xlu0 %v5098_v24, %s6179_s12  ;;  %v5106_v10 = vrot.slane %v5099_v7, %v6449_v0  ;;  %v5114_v59 = vrot.slane %v5589_v49, %v6449_v0 }
 0x4da   :  { %v5122_v14 = vrot.slane %v5115_v40, %v6449_v0  ;;  %v5130_v52 = vrot.slane %v5590_v51, %v6449_v0 }
 0x4db   :  { %v4919_v25 = vrot.slane %v4911_v8, %v6449_v0  ;;  %v4926_v22 = vrot.slane %v4912_v35, %v6449_v0  ;;  %v5131_v42 = vcombine.low %v5106_v10, %v5114_v59  ;;  %v5132_v56 = vcombine.high %v5106_v10, %v5114_v59 }
 0x4dc   :  { %v5147_v26 = vcombine.low %v5122_v14, %v5130_v52  ;;  %v5148_v18 = vcombine.high %v5122_v14, %v5130_v52 }
 0x4dd   :  { %v4927_v63 = vcombine.low %v4903_v54, %v4919_v25  ;;  %v4928_v61 = vcombine.high %v4903_v54, %v4919_v25  ;;  %v4943_v3 = vcombine.low %v4910_v38, %v4926_v22  ;;  %v4944_v4 = vcombine.high %v4910_v38, %v4926_v22 }
 0x4de   :  { %v7276_v15 = vrot.slane %v5131_v42, %v6453_v6  ;;  %v7279_v11 = vrot.slane %v5147_v26, %v6453_v6  ;;  %v5146_v30 = vrot.slane %v5132_v56, %v6453_v6  ;;  %v5162_v27 = vrot.slane %v5148_v18, %v6453_v6 }
 0x4df   :  { %v4935_v58 = vrot.slane %v4927_v63, %v6453_v6  ;;  %v4942_v20 = vrot.slane %v4928_v61, %v6453_v6  ;;  %v4951_v62 = vrot.slane %v4943_v3, %v6453_v6  ;;  %v4958_v32 = vrot.slane %v4944_v4, %v6453_v6 }
 0x4e0   :  { %v5164_v12 = vcombine.high %v7276_v15, %v7279_v11  ;;  %v5165_v34 = vcombine.low %v5146_v30, %v5162_v27  ;;  %v5166_v24 = vcombine.high %v5146_v30, %v5162_v27  ;;  %v5163_v53 = vcombine.low %v7276_v15, %v7279_v11 }
 0x4e1   :  { %v5167_v60 = vcombine.low %v4935_v58, %v4942_v20  ;;  %v5591_v50 = vcombine.high %v4935_v58, %v4942_v20  ;;  %v5183_v23 = vcombine.low %v4951_v62, %v4958_v32  ;;  %v5592_v37 = vcombine.high %v4951_v62, %v4958_v32 }
 0x4e2   :  { %5309 = vrot.lane.b32.xlu1 %v5164_v12, %s6177_s5 }
 0x4e3   :  { %v5174_v55 = vrot.slane %v5167_v60, %v6449_v0  ;;  %v5182_v48 = vrot.slane %v5591_v50, %v6449_v0  ;;  %v5190_v28 = vrot.slane %v5183_v23, %v6449_v0  ;;  %v5198_v44 = vrot.slane %v5592_v37, %v6449_v0 }
 0x4e5   :  { %v5199_v57 = vcombine.low %v5174_v55, %v5182_v48  ;;  %v5215_v33 = vcombine.low %v5190_v28, %v5198_v44  ;;  %v5200_v21 = vcombine.high %v5174_v55, %v5182_v48  ;;  %v5216_v45 = vcombine.high %v5190_v28, %v5198_v44 }
 0x4e6   :  { %5325 = vrot.lane.b32.xlu1 %v5165_v34, %s6178_s18 }
 0x4e7   :  { %v7298_v31 = vrot.slane %v5199_v57, %v6453_v6  ;;  %v7301_v19 = vrot.slane %v5215_v33, %v6453_v6  ;;  %v5214_v1 = vrot.slane %v5200_v21, %v6453_v6  ;;  %v5230_v39 = vrot.slane %v5216_v45, %v6453_v6 }
 0x4e9   :  { %v5232_v16 = vcombine.high %v7298_v31, %v7301_v19  ;;  %v5233_v36 = vcombine.low %v5214_v1, %v5230_v39  ;;  %v5234_v13 = vcombine.high %v5214_v1, %v5230_v39  ;;  %v5231_v9 = vcombine.low %v7298_v31, %v7301_v19  ;;  %v5595_v31 = vld [vmem:[%s7389_s10] ss:$0 sm:$0xff]  ;;  %s6134_s10 = scalar_lea.vmem %s5487_s1, 512 }
 0x4ea   :  { %5341 = vrot.lane.b32.xlu1 %v5166_v24, %s6179_s12  ;;  %p6135_p4 = scmp.ne.s32.totalorder %s5487_s1, %s6134_s10  ;;  %p6140_p6 = scmp.lt.s32.totalorder %s6134_s10, %s6134_s10 }
 0x4eb   :  { %5311 = vrot.lane.b32.xlu0 %v5232_v16, %s6177_s5 }
 0x4ec   :  { %p6141_p7 = por %p6140_p6, %p6139_p5 }
 0x4ee   :  { %p6142_p8 = pnand %p6141_p7, %p6135_p4 }
 0x4ef   :  { %5327 = vrot.lane.b32.xlu0 %v5233_v36, %s6178_s18 }
 0x4f3   :  { %5343 = vrot.lane.b32.xlu0 %v5234_v13, %s6179_s12 }
 0x517   :  { %v4536_v7 = vpop.f32.mrb[30].mxu0  ;;  %v4609_v49 = vpop.f32.mrb[38].mxu1 }
 0x518   :  { %v5886_v40 = vpop.f32.mrb[31].mxu0  ;;  %v5891_v51 = vpop.f32.mrb[39].mxu1 }
 0x51b   :  { %v4682_v54 = vpop.f32.mrb[32].mxu0  ;;  %v4755_v43 = vpop.f32.mrb[40].mxu1 }
 0x51c   :  { %v4963_v8 = vcombine.low %v4536_v7, %v4682_v54  ;;  %v4964_v35 = vcombine.high %v4536_v7, %v4682_v54  ;;  %v4979_v17 = vcombine.low %v4609_v49, %v4755_v43  ;;  %v4980_v10 = vcombine.high %v4609_v49, %v4755_v43  ;;  %v5896_v59 = vpop.f32.mrb[33].mxu0  ;;  %v5901_v29 = vpop.f32.mrb[41].mxu1 }
 0x51e   :  { %v4971_v46 = vrot.slane %v4963_v8, %v6449_v0  ;;  %v4978_v38 = vrot.slane %v4964_v35, %v6449_v0  ;;  %v4987_v14 = vrot.slane %v4979_v17, %v6449_v0  ;;  %v4994_v52 = vrot.slane %v4980_v10, %v6449_v0 }
 0x520   :  { %v4995_v5 = vcombine.low %v4971_v46, %v4987_v14  ;;  %v4996_v25 = vcombine.high %v4971_v46, %v4987_v14  ;;  %v5011_v22 = vcombine.low %v4978_v38, %v4994_v52  ;;  %v5012_v42 = vcombine.high %v4978_v38, %v4994_v52 }
 0x522   :  { %v5003_v56 = vrot.slane %v4995_v5, %v6453_v6  ;;  %v5010_v26 = vrot.slane %v4996_v25, %v6453_v6  ;;  %v5019_v18 = vrot.slane %v5011_v22, %v6453_v6  ;;  %v5026_v63 = vrot.slane %v5012_v42, %v6453_v6 }
 0x524   :  { %v5235_v61 = vcombine.low %v5003_v56, %v5010_v26  ;;  %v5593_v3 = vcombine.high %v5003_v56, %v5010_v26  ;;  %v5251_v4 = vcombine.low %v5019_v18, %v5026_v63  ;;  %v5594_v30 = vcombine.high %v5019_v18, %v5026_v63 }
 0x526   :  { %v5242_v27 = vrot.slane %v5235_v61, %v6449_v0  ;;  %v5250_v58 = vrot.slane %v5593_v3, %v6449_v0  ;;  %v5258_v20 = vrot.slane %v5251_v4, %v6449_v0  ;;  %v5266_v62 = vrot.slane %v5594_v30, %v6449_v0 }
 0x528   :  { %v5267_v32 = vcombine.low %v5242_v27, %v5250_v58  ;;  %v5283_v12 = vcombine.low %v5258_v20, %v5266_v62  ;;  %v5268_v34 = vcombine.high %v5242_v27, %v5250_v58  ;;  %v5284_v24 = vcombine.high %v5258_v20, %v5266_v62 }
 0x52a   :  { %v5275_v60 = vrot.slane %v5267_v32, %v6453_v6  ;;  %v5291_v50 = vrot.slane %v5283_v12, %v6453_v6  ;;  %v5282_v23 = vrot.slane %v5268_v34, %v6453_v6  ;;  %v5298_v37 = vrot.slane %v5284_v24, %v6453_v6 }
 0x52c   :  { %v5300_v55 = vcombine.high %v5275_v60, %v5291_v50  ;;  %v5301_v48 = vcombine.low %v5282_v23, %v5298_v37  ;;  %v5302_v28 = vcombine.high %v5282_v23, %v5298_v37  ;;  %v5299_v44 = vcombine.low %v5275_v60, %v5291_v50 }
 0x52e   :  { %5313 = vrot.lane.b32.xlu1 %v5300_v55, %s6177_s5 }
 0x532   :  { %5329 = vrot.lane.b32.xlu1 %v5301_v48, %s6178_s18 }
 0x536   :  { %5345 = vrot.lane.b32.xlu1 %v5302_v28, %s6179_s12 }
 0x543   :  { %v5308_v0 = vpop.permute.xlu0 %5307 }
 0x544   :  { %v5351_v33 = vsel %vm2181_vm2, %v5095_v2, %v5308_v0 }
 0x547   :  { %v5324_v57 = vpop.permute.xlu0 %5323 }
 0x548   :  { %v5355_v6 = vsel %vm115_vm0, %v5351_v33, %v5324_v57 }
 0x54b   :  { %v5340_v21 = vpop.permute.xlu0 %5339 }
 0x54c   :  { %v5360_v45 = vsel %vm5359_vm4, %v5355_v6, %v5340_v21 }
 0x54d   :  { %5918 = vmatprep.mubr.msk.f32.mxu0 %vm5379_vm5, %v5360_v45 }
 0x554   :  { %v5310_v1 = vpop.permute.xlu1 %5309 }
 0x555   :  { %v5352_v16 = vsel %vm2181_vm2, %v5163_v53, %v5310_v1 }
 0x558   :  { %v5326_v39 = vpop.permute.xlu1 %5325 }
 0x559   :  { %v5356_v36 = vsel %vm115_vm0, %v5352_v16, %v5326_v39 }
 0x55c   :  { %v5342_v41 = vpop.permute.xlu1 %5341 }
 0x55d   :  { %v5312_v47 = vpop.permute.xlu0 %5311  ;;  %v5361_v2 = vsel %vm5359_vm4, %v5356_v36, %v5342_v41 }
 0x55e   :  { %5919 = vmatmul.mubr.msk.f32.vlgmr.msra.gmra.mrb[34].mxu0 %vm5379_vm5, %v5361_v2  ;;  %v5353_v7 = vsel %vm2181_vm2, %v5231_v9, %v5312_v47 }
 0x561   :  { %v5328_v13 = vpop.permute.xlu0 %5327 }
 0x562   :  { %v5357_v49 = vsel %vm115_vm0, %v5353_v7, %v5328_v13 }
 0x565   :  { %v5344_v40 = vpop.permute.xlu0 %5343 }
 0x566   :  { %v5362_v15 = vsel %vm5359_vm4, %v5357_v49, %v5344_v40 }
 0x567   :  { %5921 = vmatprep.mubr.msk.f32.mxu0 %vm5379_vm5, %v5362_v15 }
 0x5a0   :  { %v5314_v11 = vpop.permute.xlu1 %5313 }
 0x5a1   :  { %v5354_v51 = vsel %vm2181_vm2, %v5299_v44, %v5314_v11 }
 0x5a4   :  { %v5330_v53 = vpop.permute.xlu1 %5329 }
 0x5a5   :  { %v5358_v54 = vsel %vm115_vm0, %v5354_v51, %v5330_v53 }
 0x5a8   :  { %v5346_v43 = vpop.permute.xlu1 %5345 }
 0x5a9   :  { %v5363_v8 = vsel %vm5359_vm4, %v5358_v54, %v5346_v43 }
 0x5aa   :  { %5922 = vmatmul.mubr.msk.f32.gmra.mrb[36].mxu0 %vm5379_vm5, %v5363_v8 }
 0x631   :  { %v5920_v19 = vpop.f32.mrb[34].mxu0 }
 0x632   :  { %v5464_v9 = vadd.f32 %v5920_v19, %v5595_v31  ;;  %v5458_v35 = vpop.f32.mrb[35].mxu0 }
 0x633   :  { %v5459_v17 = vadd.f32 %v5595_v31, %v5458_v35 }
 0x634   :  { %5478 = vst.msk [vmem:[#allocation10 + $0x8] sm:$0xff] %vm115_vm0, %v5464_v9 }
 0x635   :  { %5477 = vst.msk [vmem:[#allocation10] sm:$0xff] %vm115_vm0, %v5459_v17 }
 0x67d   :  { %v5923_v10 = vpop.f32.mrb[36].mxu0 }
 0x67e   :  { %v5474_v59 = vadd.f32 %v5923_v10, %v5595_v31  ;;  %v5468_v29 = vpop.f32.mrb[37].mxu0 }
 0x67f   :  { %v5469_v46 = vadd.f32 %v5595_v31, %v5468_v29 }
 0x680   :  { %5480 = vst.msk [vmem:[#allocation10 + $0x18] sm:$0xff] %vm115_vm0, %v5474_v59 }
 0x681   :  { %5479 = vst.msk [vmem:[#allocation10 + $0x10] sm:$0xff] %vm115_vm0, %v5469_v46 }
 0x682   :  { %6145 = shalt.err (!%p6142_p8)
}
 0x683   :  { %s6146_s16 = scalar_lea.hbm %s7390_s11, 512 }
 0x684   :  { %p6147_p9 = scmp.ne.s32.totalorder %s7390_s11, %s6146_s16  ;;  %p6150_p10 = scmp.lt.u32.totalorder %s6146_s16, %s7390_s11 }
 0x686   :  { %p6152_p11 = pnand %p6150_p10, %p6147_p9 }
 0x688   :  { %6155 = shalt.err (!%p6152_p11)
}
 0x689   :  { %5492 = dma.vmem_to_hbm [thread:$0]  %s5487_s1, 512, %s7390_s11, [#allocation4], %s6166_s29, %s6166_s29, %s6167_s30  }
 0x68a   :  { %6162 = dma.done.wait [#allocation4], 512  }
 0x68b   :  { %6163 = vsyncadd [#allocation4], 4294966784 }
 0x68c   :  { %5496 = vsyncpa [#allocation3], 1 }
 0x68d   :  { %5497 = vsyncpa [#allocation6], 1 }
 0x68e   :  { %5498 = vsyncpa [#allocation9], 1 }
 0x68f   :  { %5499 = vsyncpa [#allocation4], 1 }

</bundles_post_ra>
